<compile_context>
chip_gen: v5e
topology: v5e:2x2
jax: 0.10.0
libtpu: 0.0.40
codegen_flags: <defaults>
</compile_context>

<pallas_src>
import jax
import jax.numpy as jnp
from jax.experimental import pallas as pl
from jax.experimental.pallas import tpu as pltpu

POOL_K = 5          # nn.AvgPool2d(kernel_size=5, stride=3)
POOL_S = 3
C_RES = 128         # ResidualBlock out_channels
H2 = 5              # spatial size after the two padding=1 1x1 convs (1->3->5)
FC_HID = 1024
FOLD_K = 3 * C_RES  # 384: [outer-ring, inner-ring, center] folded fc1 K dim


# ----------------------------- fused kernel ----------------------------------

def _inception_aux_kernel(x_ref, w1_ref, c1_ref, w2_ref, c2o_ref, c2i_ref,
                          fc1w_ref, fc1b_ref, fc2w_ref, fc2b_ref, o_ref):
  # --- AvgPool2d(5,3): the asserted 1x1 output map == exactly one 5x5 window,
  # so a single static slice + reduce (no strided window slicing).
  x = x_ref[...]                                              # (N,H,W,C)
  p = jnp.mean(x[:, :POOL_K, :POOL_K, :], axis=(1, 2))        # (N,C)

  # --- ResidualBlock(kernel_size=1, padding=1) with bias + eval-BN folded into
  # (W, c). Because the pooled map is 1x1 and the convs are 1x1 with zero
  # padding, the 5x5 output has only three distinct spatial values:
  #   outer ring (conv2 sees zeros):       relu(p + c2)
  #   inner ring (conv2 sees relu(c1)):    relu(p + c2 + relu(c1)@W2)
  #   center (conv2 sees conv1's output):  relu(p + c2 + relu(p@W1+c1)@W2)
  y1c = jnp.maximum(
      jnp.dot(p, w1_ref[...], preferred_element_type=jnp.float32)
      + c1_ref[...], 0.0)                                     # (N,C)
  kc = jnp.dot(y1c, w2_ref[...], preferred_element_type=jnp.float32)
  base = p + c2o_ref[...]
  v_out = jnp.maximum(base, 0.0)                              # 16 positions
  v_in = jnp.maximum(p + c2i_ref[...], 0.0)                   # 8 positions
  v_ct = jnp.maximum(base + kc, 0.0)                          # 1 position

  # --- fc1 with ring-folded weight (384 x 1024): fc1(flatten(y2)) is exactly
  # v_out @ sum(outer rows) + v_in @ sum(inner rows) + v_ct @ center rows.
  v_cat = jnp.concatenate([v_out, v_in, v_ct], axis=-1).astype(fc1w_ref.dtype)
  h1 = jnp.maximum(
      jnp.dot(v_cat, fc1w_ref[...], preferred_element_type=jnp.float32)
      + fc1b_ref[...], 0.0)                                   # (N,1024)

  # TODO(synk): Dropout(p=0.7) modelled in eval mode (identity); a train-mode
  # dropout would draw a mask with pltpu.prng_random_bits.
  o_ref[...] = (jnp.dot(h1.astype(fc2w_ref.dtype), fc2w_ref[...],
                        preferred_element_type=jnp.float32)
                + fc2b_ref[...])                              # (N,128) padded


# ----------------------------- wrapper ---------------------------------------

def inception_aux_forward(x_nchw, kp, num_classes):
  """Fused InceptionAux forward. x_nchw: (N, C, H, W) float32."""
  x = jnp.transpose(x_nchw, (0, 2, 3, 1)).astype(jnp.float32)   # NHWC (lane=C)
  n, h, w, cin = x.shape
  ho = (h - POOL_K) // POOL_S + 1
  wo = (w - POOL_K) // POOL_S + 1
  # The ResidualBlock residual add only broadcasts for a 1x1 pooled map with
  # in_channels == 128 (same constraint as the PyTorch forward).
  assert ho == 1 and wo == 1 and cin == C_RES, (
      "forward is only runnable for pooled 1x1 maps with in_channels == 128")

  vmem = pl.BlockSpec(memory_space=pltpu.MemorySpace.VMEM)
  out_pad = pl.pallas_call(
      _inception_aux_kernel,
      out_shape=jax.ShapeDtypeStruct((n, 128), jnp.float32),
      in_specs=[vmem] * 10,        # all operands resident (~1.2 MiB), no grid
      out_specs=vmem,
  )(x, kp["conv1_w"], kp["conv1_c"], kp["conv2_w"], kp["conv2_c_outer"],
    kp["conv2_c_inner"], kp["fc1_w"], kp["fc1_b"], kp["fc2_w"], kp["fc2_b"])

  return out_pad[:, :num_classes]


# ----------------------------- parameters ------------------------------------

def init_params(key, in_channels, num_classes, flat_features):
  """Torch-layout f32 parameters (conv W as (Cin,Cout); fc W as (in,out))."""
  ks = jax.random.split(key, 16)
  eps = 1e-5

  def rnd(k, shape, s=0.05):
    return jax.random.normal(k, shape, dtype=jnp.float32) * s

  def bn(kg, kb, km, kv):
    gamma = 1.0 + rnd(kg, (1, C_RES))
    beta = rnd(kb, (1, C_RES))
    mean = rnd(km, (1, C_RES))
    var = 1.0 + jnp.abs(rnd(kv, (1, C_RES)))
    scale = gamma / jnp.sqrt(var + eps)
    shift = beta - mean * scale
    return scale, shift

  bn1_scale, bn1_shift = bn(ks[2], ks[3], ks[4], ks[5])
  bn2_scale, bn2_shift = bn(ks[8], ks[9], ks[10], ks[11])

  return {
      # conv weights stored as (C_in, C_out) == torch_weight[:, :, 0, 0].T
      "conv1_w": rnd(ks[0], (in_channels, C_RES)),
      "conv1_b": rnd(ks[1], (1, C_RES)),
      "bn1_scale": bn1_scale, "bn1_shift": bn1_shift,
      "conv2_w": rnd(ks[6], (C_RES, C_RES)),
      "conv2_b": rnd(ks[7], (1, C_RES)),
      "bn2_scale": bn2_scale, "bn2_shift": bn2_shift,
      # fc weights stored transposed: (in_features, out_features)
      "fc1_w": rnd(ks[12], (flat_features, FC_HID), 0.02),
      "fc1_b": rnd(ks[13], (1, FC_HID)),
      "fc2_w": rnd(ks[14], (FC_HID, num_classes), 0.02),
      "fc2_b": rnd(ks[15], (1, num_classes)),
  }


def prepare_params(params):
  """Fold bias + eval-mode BN into the conv weights, ring-fold fc1's weight
  (torch NCHW-flatten rows -> [outer-sum, inner-sum, center] = 384x1024),
  pad fc2 to 128 output lanes, cast fc weights to bf16."""
  def fold(w, b, scale, shift):
    return w * scale, b * scale + shift                  # per-output-channel

  w1, c1 = fold(params["conv1_w"], params["conv1_b"],
                params["bn1_scale"], params["bn1_shift"])
  w2, c2 = fold(params["conv2_w"], params["conv2_b"],
                params["bn2_scale"], params["bn2_shift"])
  # conv2 applied to conv1's padding-ring output relu(c1) is input-independent.
  c2_inner = c2 + jnp.maximum(c1, 0.0) @ w2

  # fc1 rows are in torch NCHW-flatten order (c*25 + h*5 + w). Ring-fold them:
  # the 5x5 post-residual map has only 3 distinct spatial values, so fc1 only
  # ever needs the per-ring row sums.  NOTE: the same folding must be applied
  # when loading real PyTorch checkpoints, or results will silently diverge.
  w4 = params["fc1_w"].reshape(C_RES, H2, H2, FC_HID)
  hh = jnp.arange(H2)[:, None]
  ww = jnp.arange(H2)[None, :]
  outer = (hh == 0) | (hh == H2 - 1) | (ww == 0) | (ww == H2 - 1)
  center = (hh == H2 // 2) & (ww == H2 // 2)
  inner = jnp.logical_and(~outer, ~center)
  w_outer = jnp.einsum("chwf,hw->cf", w4, outer.astype(jnp.float32))
  w_inner = jnp.einsum("chwf,hw->cf", w4, inner.astype(jnp.float32))
  w_center = w4[:, H2 // 2, H2 // 2, :]
  fc1_w_folded = jnp.concatenate([w_outer, w_inner, w_center], axis=0)  # (384,1024)

  ncls = params["fc2_w"].shape[1]
  assert ncls <= 128
  fc2_w = jnp.pad(params["fc2_w"], ((0, 0), (0, 128 - ncls)))
  fc2_b = jnp.pad(params["fc2_b"], ((0, 0), (0, 128 - ncls)))

  return {
      "conv1_w": w1, "conv1_c": c1,
      "conv2_w": w2, "conv2_c_outer": c2, "conv2_c_inner": c2_inner,
      "fc1_w": fc1_w_folded.astype(jnp.bfloat16), "fc1_b": params["fc1_b"],
      "fc2_w": fc2_w.astype(jnp.bfloat16), "fc2_b": fc2_b,
  }


# ----------------------------- pure-JAX reference -----------------------------

def reference_forward(x_nchw, params):
  """Un-fused, un-folded reference; mirrors the kernel's bf16 quantization of
  the fc weights/activations (accumulation stays f32 on both sides)."""
  x = jnp.transpose(x_nchw, (0, 2, 3, 1)).astype(jnp.float32)
  p = jnp.mean(x[:, :POOL_K, :POOL_K, :], axis=(1, 2), keepdims=True)  # (N,1,1,C)
  p_pad = jnp.pad(p, ((0, 0), (1, 1), (1, 1), (0, 0)))
  y1 = p_pad @ params["conv1_w"] + params["conv1_b"][0]
  y1 = jnp.maximum(y1 * params["bn1_scale"][0] + params["bn1_shift"][0], 0.0)
  y1_pad = jnp.pad(y1, ((0, 0), (1, 1), (1, 1), (0, 0)))
  y2 = y1_pad @ params["conv2_w"] + params["conv2_b"][0]
  y2 = y2 * params["bn2_scale"][0] + params["bn2_shift"][0]
  y2 = jnp.maximum(y2 + p, 0.0)                       # residual broadcast + relu
  flat = jnp.transpose(y2, (0, 3, 1, 2)).reshape(x.shape[0], -1)  # NCHW flatten
  q = lambda a: a.astype(jnp.bfloat16).astype(jnp.float32)
  h = jnp.maximum(q(flat) @ q(params["fc1_w"]) + params["fc1_b"][0], 0.0)
  return q(h) @ q(params["fc2_w"]) + params["fc2_b"][0]


# ----------------------------- main -------------------------------------------

if __name__ == "__main__":
  key = jax.random.PRNGKey(0)
  kx, kparam = jax.random.split(key)

  # in_channels must be 128 and the 5x5/stride-3 avg-pool must yield a 1x1 map
  # (H = W = 7) for the module's forward to be runnable at all.
  N, C, H, W = 2, 128, 7, 7
  num_classes = 10
  flat_features = C_RES * H2 * H2          # 3200 (see TODO re: declared 2048)

  x = jax.random.normal(kx, (N, C, H, W), dtype=jnp.float32)
  params = init_params(kparam, C, num_classes, flat_features)
  kp = prepare_params(params)

  out = inception_aux_forward(x, kp, num_classes)
  out = jax.block_until_ready(out)

  ref = reference_forward(x, params)
  assert out.shape == (N, num_classes)
  assert jnp.allclose(out, ref, atol=5e-3, rtol=5e-3), "mismatch vs JAX reference"

  print("KERNEL_OK")
</pallas_src>

<mosaic_0001>
module attributes {stable_mosaic.version = 11 : i64} {
  func.func @_inception_aux_kernel(%arg0: memref<2x7x7x128xf32, #tpu.memory_space<vmem>>, %arg1: memref<128x128xf32, #tpu.memory_space<vmem>>, %arg2: memref<1x128xf32, #tpu.memory_space<vmem>>, %arg3: memref<128x128xf32, #tpu.memory_space<vmem>>, %arg4: memref<1x128xf32, #tpu.memory_space<vmem>>, %arg5: memref<1x128xf32, #tpu.memory_space<vmem>>, %arg6: memref<384x1024xbf16, #tpu.memory_space<vmem>>, %arg7: memref<1x1024xf32, #tpu.memory_space<vmem>>, %arg8: memref<1024x128xbf16, #tpu.memory_space<vmem>>, %arg9: memref<1x128xf32, #tpu.memory_space<vmem>>, %arg10: memref<2x128xf32, #tpu.memory_space<vmem>>) attributes {dimension_semantics = [], scalar_prefetch = 0 : i64, scratch_operands = 0 : i64, tpu.core_type = #tpu.core_type<tc>} {
    %c0 = arith.constant 0 : index
    %c0_0 = arith.constant 0 : index
    %c0_1 = arith.constant 0 : index
    %c0_2 = arith.constant 0 : index
    %0 = vector.load %arg0[%c0, %c0_0, %c0_1, %c0_2] : memref<2x7x7x128xf32, #tpu.memory_space<vmem>>, vector<2x7x7x128xf32>
    %1 = vector.extract_strided_slice %0 {offsets = [0, 0, 0, 0], sizes = [2, 5, 5, 128], strides = [1, 1, 1, 1]} : vector<2x7x7x128xf32> to vector<2x5x5x128xf32>
    %cst = arith.constant dense<0.000000e+00> : vector<2x128xf32>
    %2 = vector.multi_reduction <add>, %1, %cst [1, 2] : vector<2x5x5x128xf32> to vector<2x128xf32>
    %cst_3 = arith.constant 2.500000e+01 : f32
    %3 = vector.broadcast %cst_3 : f32 to vector<2x128xf32>
    %4 = arith.divf %2, %3 : vector<2x128xf32>
    %c0_4 = arith.constant 0 : index
    %c0_5 = arith.constant 0 : index
    %5 = vector.load %arg1[%c0_4, %c0_5] : memref<128x128xf32, #tpu.memory_space<vmem>>, vector<128x128xf32>
    %cst_6 = arith.constant dense<0.000000e+00> : vector<2x128xf32>
    %6 = tpu.matmul %4, %5, %cst_6 {dimension_numbers = #tpu.dot_dimension_numbers<[1], [0], [0], [1], [0, 0, 1, 1], [], []>} : vector<2x128xf32>, vector<128x128xf32>, vector<2x128xf32> -> vector<2x128xf32>
    %c0_7 = arith.constant 0 : index
    %c0_8 = arith.constant 0 : index
    %7 = vector.load %arg2[%c0_7, %c0_8] : memref<1x128xf32, #tpu.memory_space<vmem>>, vector<1x128xf32>
    %8 = vector.broadcast %7 : vector<1x128xf32> to vector<2x128xf32>
    %9 = arith.addf %6, %8 : vector<2x128xf32>
    %cst_9 = arith.constant 0.000000e+00 : f32
    %10 = vector.broadcast %cst_9 : f32 to vector<2x128xf32>
    %11 = arith.maximumf %9, %10 : vector<2x128xf32>
    %c0_10 = arith.constant 0 : index
    %c0_11 = arith.constant 0 : index
    %12 = vector.load %arg3[%c0_10, %c0_11] : memref<128x128xf32, #tpu.memory_space<vmem>>, vector<128x128xf32>
    %cst_12 = arith.constant dense<0.000000e+00> : vector<2x128xf32>
    %13 = tpu.matmul %11, %12, %cst_12 {dimension_numbers = #tpu.dot_dimension_numbers<[1], [0], [0], [1], [0, 0, 1, 1], [], []>} : vector<2x128xf32>, vector<128x128xf32>, vector<2x128xf32> -> vector<2x128xf32>
    %c0_13 = arith.constant 0 : index
    %c0_14 = arith.constant 0 : index
    %14 = vector.load %arg4[%c0_13, %c0_14] : memref<1x128xf32, #tpu.memory_space<vmem>>, vector<1x128xf32>
    %15 = vector.broadcast %14 : vector<1x128xf32> to vector<2x128xf32>
    %16 = arith.addf %4, %15 : vector<2x128xf32>
    %cst_15 = arith.constant 0.000000e+00 : f32
    %17 = vector.broadcast %cst_15 : f32 to vector<2x128xf32>
    %18 = arith.maximumf %16, %17 : vector<2x128xf32>
    %c0_16 = arith.constant 0 : index
    %c0_17 = arith.constant 0 : index
    %19 = vector.load %arg5[%c0_16, %c0_17] : memref<1x128xf32, #tpu.memory_space<vmem>>, vector<1x128xf32>
    %20 = vector.broadcast %19 : vector<1x128xf32> to vector<2x128xf32>
    %21 = arith.addf %4, %20 : vector<2x128xf32>
    %cst_18 = arith.constant 0.000000e+00 : f32
    %22 = vector.broadcast %cst_18 : f32 to vector<2x128xf32>
    %23 = arith.maximumf %21, %22 : vector<2x128xf32>
    %24 = arith.addf %16, %13 : vector<2x128xf32>
    %cst_19 = arith.constant 0.000000e+00 : f32
    %25 = vector.broadcast %cst_19 : f32 to vector<2x128xf32>
    %26 = arith.maximumf %24, %25 : vector<2x128xf32>
    %27 = tpu.concatenate %18, %23, %26 in 1 : vector<2x128xf32>, vector<2x128xf32>, vector<2x128xf32> -> vector<2x384xf32>
    %28 = arith.truncf %27 : vector<2x384xf32> to vector<2x384xbf16>
    %c0_20 = arith.constant 0 : index
    %c0_21 = arith.constant 0 : index
    %29 = vector.load %arg6[%c0_20, %c0_21] : memref<384x1024xbf16, #tpu.memory_space<vmem>>, vector<384x1024xbf16>
    %cst_22 = arith.constant dense<0.000000e+00> : vector<2x1024xf32>
    %30 = tpu.matmul %28, %29, %cst_22 {dimension_numbers = #tpu.dot_dimension_numbers<[1], [0], [0], [1], [0, 0, 1, 1], [], []>} : vector<2x384xbf16>, vector<384x1024xbf16>, vector<2x1024xf32> -> vector<2x1024xf32>
    %c0_23 = arith.constant 0 : index
    %c0_24 = arith.constant 0 : index
    %31 = vector.load %arg7[%c0_23, %c0_24] : memref<1x1024xf32, #tpu.memory_space<vmem>>, vector<1x1024xf32>
    %32 = vector.broadcast %31 : vector<1x1024xf32> to vector<2x1024xf32>
    %33 = arith.addf %30, %32 : vector<2x1024xf32>
    %cst_25 = arith.constant 0.000000e+00 : f32
    %34 = vector.broadcast %cst_25 : f32 to vector<2x1024xf32>
    %35 = arith.maximumf %33, %34 : vector<2x1024xf32>
    %36 = arith.truncf %35 : vector<2x1024xf32> to vector<2x1024xbf16>
    %c0_26 = arith.constant 0 : index
    %c0_27 = arith.constant 0 : index
    %37 = vector.load %arg8[%c0_26, %c0_27] : memref<1024x128xbf16, #tpu.memory_space<vmem>>, vector<1024x128xbf16>
    %cst_28 = arith.constant dense<0.000000e+00> : vector<2x128xf32>
    %38 = tpu.matmul %36, %37, %cst_28 {dimension_numbers = #tpu.dot_dimension_numbers<[1], [0], [0], [1], [0, 0, 1, 1], [], []>} : vector<2x1024xbf16>, vector<1024x128xbf16>, vector<2x128xf32> -> vector<2x128xf32>
    %c0_29 = arith.constant 0 : index
    %c0_30 = arith.constant 0 : index
    %39 = vector.load %arg9[%c0_29, %c0_30] : memref<1x128xf32, #tpu.memory_space<vmem>>, vector<1x128xf32>
    %40 = vector.broadcast %39 : vector<1x128xf32> to vector<2x128xf32>
    %41 = arith.addf %38, %40 : vector<2x128xf32>
    %c0_31 = arith.constant 0 : index
    %c0_32 = arith.constant 0 : index
    %42 = vector.load %arg10[%c0_31, %c0_32] : memref<2x128xf32, #tpu.memory_space<vmem>>, vector<2x128xf32>
    tpu.vector_store %arg10[%c0_31, %c0_32], %41 {strides = array<i32>} : memref<2x128xf32, #tpu.memory_space<vmem>>, vector<2x128xf32>,
    return
  }
}

</mosaic_0001>

<bundles_post_ra>
// kernel: tpu_custom_call.1
= control target key start
LH: loop header
LB: loop body
LE: loop exit
PB: predicated region body
PF: predicated region fallthrough
CT: control target
= control target key end

     0   :  { %15 = vsyncpa [#allocation3], 0  ;;  %s4071_s0 = inlined_call_operand.vmem [shape: f32[2,7,7,128], index: 0, kind: input, shape index: {}]   ;;  %s4072_s1 = inlined_call_operand.vmem [shape: f32[128,128], index: 1, kind: input, shape index: {}]   ;;  %s4073_s2 = inlined_call_operand.vmem [shape: f32[1,128], index: 2, kind: input, shape index: {}]   ;;  %s4074_s3 = inlined_call_operand.hbm [shape: f32[128,128], index: 3, kind: input, shape index: {}]   ;;  %s4075_s4 = inlined_call_operand.vmem [shape: f32[1,128], index: 4, kind: input, shape index: {}]   ;;  %s4076_s5 = inlined_call_operand.vmem [shape: f32[1,128], index: 5, kind: input, shape index: {}]   ;;  %s4077_s6 = inlined_call_operand.hbm [shape: bf16[384,1024], index: 6, kind: input, shape index: {}]   ;;  %s4078_s7 = inlined_call_operand.vmem [shape: f32[1,1024], index: 7, kind: input, shape index: {}]   ;;  %s4079_s8 = inlined_call_operand.hbm [shape: bf16[1024,128], index: 8, kind: input, shape index: {}]   ;;  %s4080_s9 = inlined_call_operand.vmem [shape: f32[1,128], index: 9, kind: input, shape index: {}]   ;;  %s4081_s10 = inlined_call_operand.hbm [shape: f32[2,128], index: 10, kind: output, shape index: {}]  }
   0x1   :  { %16 = vsyncpa [#allocation6], 0  ;;  %s45_s15 = sshll.u32 %s4077_s6, 4  ;;  %s46_s15 = int_to_ptr.hbm [resolvable:$true] %s45_s15 }
   0x2   :  { %17 = vsyncpa [#allocation4], 0  ;;  %s3793_s16 = smov [#allocation5]   ;;  %s28_s20 = sshll.u32 %s4074_s3, 4  ;;  %s29_s20 = int_to_ptr.hbm [resolvable:$true] %s28_s20 }
   0x3   :  { %s47_s17 = sshll.u32 %s3793_s16, 4  ;;  %s3794_s21 = smov 512   ;;  %s48_s17 = int_to_ptr.vmem [resolvable:$true] %s47_s17 }
   0x4   :  { %s3795_s22 = smov 32   ;;  %s3796_s23 = smov [#allocation2]  }
   0x5   :  { %53 = dma.hbm_to_vmem [thread:$0]  %s46_s15, 24576, %s48_s17, [#allocation6], %s3794_s21, %s3794_s21, %s3795_s22  }
   0x6   :  { %s30_s24 = sshll.u32 %s3796_s23, 4  ;;  %s3797_s25 = smov 128   ;;  %s31_s24 = int_to_ptr.vmem [resolvable:$true] %s30_s24 }
   0x7   :  { %s3798_s26 = smov 8   ;;  %s60_s28 = sshll.u32 %s4079_s8, 4  ;;  %s61_s28 = int_to_ptr.hbm [resolvable:$true] %s60_s28 }
   0x8   :  { %36 = dma.hbm_to_vmem [thread:$0]  %s29_s20, 2048, %s31_s24, [#allocation3], %s3797_s25, %s3797_s25, %s3798_s26  }
   0x9   :  { %s3799_s29 = smov [#allocation7]   ;;  %s3800_s11 = smov 64  }
   0xa   :  { %s62_s30 = sshll.u32 %s3799_s29, 4  ;;  %s3801_s3 = smov 4   ;;  %s63_s30 = int_to_ptr.vmem [resolvable:$true] %s62_s30 }
   0xb   :  { %68 = dma.hbm_to_vmem [thread:$0]  %s61_s28, 8192, %s63_s30, [#allocation6], %s3800_s11, %s3800_s11, %s3801_s3  }
   0xc   :  { %3787 = dma.done.wait [#allocation3], 2048  }
   0xd   :  { %3788 = vsyncadd [#allocation3], 4294965248 }
   0xe   :  { %3789 = dma.done.wait [#allocation6], 32768  }
   0xf   :  { %3790 = vsyncadd [#allocation6], 4294934528  ;;  %v3802_v0 = vmov 25.0   ;;  %v148_v1 = vld [vmem:[%s4072_s1 + $0x78] sm:$0xff]  ;;  %v147_v2 = vld [vmem:[%s4072_s1 + $0x70] sm:$0xff]  ;;  %vm93_vm0 = vcmask 1044480  }
  0x10   :  { %3689 = vrcp.f32 %v3802_v0  ;;  %158 = vmatpush.msra.mxu0 %v148_v1  ;;  %v146_v3 = vld [vmem:[%s4072_s1 + $0x68] sm:$0xff]  ;;  %v145_v4 = vld [vmem:[%s4072_s1 + $0x60] sm:$0xff]  ;;  %v144_v8 = vld [vmem:[%s4072_s1 + $0x58] sm:$0xff]  ;;  %vm155_vm2 = vcmask 1041409   ;;  %s2383_s24 = sshll.u32 %s4081_s10, 4  ;;  %s2384_s24 = int_to_ptr.hbm [resolvable:$true] %s2383_s24 }
  0x11   :  { %v83_v6 = vld [vmem:[%s4071_s0] sm:$0x7f]  ;;  %v84_v7 = vld [vmem:[%s4071_s0 + $0x8] sm:$0x7f]  ;;  %v85_v9 = vld [vmem:[%s4071_s0 + $0x10] sm:$0x7f] }
  0x12   :  { %159 = vmatpush.msra.mxu0 %v147_v2  ;;  %v86_v10 = vld [vmem:[%s4071_s0 + $0x18] sm:$0x7f]  ;;  %v89_v12 = vld [vmem:[%s4071_s0 + $0x40] sm:$0x7f]  ;;  %v90_v13 = vld [vmem:[%s4071_s0 + $0x48] sm:$0x7f] }
  0x13   :  { %v88_v11 = vld [vmem:[%s4071_s0 + $0x38] sm:$0x7f]  ;;  %v143_v14 = vld [vmem:[%s4072_s1 + $0x50] sm:$0xff]  ;;  %v87_v15 = vld [vmem:[%s4071_s0 + $0x20] sm:$0x7f]  ;;  %v94_v16 = vsel %vm93_vm0, %v83_v6, 0.0 }
  0x14   :  { %160 = vmatpush.msra.mxu0 %v146_v3  ;;  %v95_v17 = vsel %vm93_vm0, %v84_v7, 0.0  ;;  %v91_v19 = vld [vmem:[%s4071_s0 + $0x50] sm:$0x7f]  ;;  %v97_v21 = vsel %vm93_vm0, %v85_v9, 0.0  ;;  %v194_v22 = vld [vmem:[#allocation2 + $0x78] sm:$0xff]  ;;  %v142_v23 = vld [vmem:[%s4072_s1 + $0x48] sm:$0xff] }
  0x15   :  { %v96_v20 = vadd.f32 %v95_v17, %v94_v16  ;;  %v99_v24 = vsel %vm93_vm0, %v86_v10, 0.0  ;;  %v109_v25 = vsel %vm93_vm0, %v88_v11, 0.0  ;;  %v110_v26 = vsel %vm93_vm0, %v89_v12, 0.0  ;;  %195 = vmatpush.msra.mxu1 %v194_v22  ;;  %v92_v28 = vld [vmem:[%s4071_s0 + $0x58] sm:$0x7f]  ;;  %v193_v31 = vld [vmem:[#allocation2 + $0x70] sm:$0xff] }
  0x16   :  { %v3880_v5 = vpop.eup %3689  ;;  %161 = vmatpush.msra.mxu0 %v145_v4  ;;  %v112_v27 = vsel %vm93_vm0, %v90_v13, 0.0  ;;  %v111_v30 = vadd.f32 %v110_v26, %v109_v25  ;;  %v141_v32 = vld [vmem:[%s4072_s1 + $0x40] sm:$0xff]  ;;  %v101_v33 = vsel %vm93_vm0, %v87_v15, 0.0  ;;  %v114_v34 = vsel %vm93_vm0, %v91_v19, 0.0  ;;  %v192_v35 = vld [vmem:[#allocation2 + $0x68] sm:$0xff]  ;;  %v140_v39 = vld [vmem:[%s4072_s1 + $0x38] sm:$0xff] }
  0x17   :  { %v125_v18 = vmul.f32 25.0, %v3880_v5  ;;  %v98_v29 = vadd.f32 %v97_v21, %v96_v20  ;;  %196 = vmatpush.msra.mxu1 %v193_v31  ;;  %v191_v38 = vld [vmem:[#allocation2 + $0x60] sm:$0xff]  ;;  %v116_v40 = vsel %vm93_vm0, %v92_v28, 0.0  ;;  %v190_v44 = vld [vmem:[#allocation2 + $0x58] sm:$0xff]  ;;  %v139_v45 = vld [vmem:[%s4072_s1 + $0x30] sm:$0xff]  ;;  %vm129_vm1 = vweird.f32 %v3880_v5 }
  0x18   :  { %162 = vmatpush.msra.mxu0 %v144_v8  ;;  %v113_v37 = vadd.f32 %v112_v27, %v111_v30  ;;  %v189_v48 = vld [vmem:[#allocation2 + $0x50] sm:$0xff]  ;;  %v138_v49 = vld [vmem:[%s4072_s1 + $0x28] sm:$0xff]  ;;  %v137_v54 = vld [vmem:[%s4072_s1 + $0x20] sm:$0xff] }
  0x19   :  { %v100_v36 = vadd.f32 %v99_v24, %v98_v29  ;;  %v126_v41 = vsub.f32 1.0, %v125_v18  ;;  %197 = vmatpush.msra.mxu1 %v192_v35  ;;  %v188_v53 = vld [vmem:[#allocation2 + $0x48] sm:$0xff]  ;;  %v187_v57 = vld [vmem:[#allocation2 + $0x40] sm:$0xff]  ;;  %v136_v58 = vld [vmem:[%s4072_s1 + $0x18] sm:$0xff] }
  0x1a   :  { %163 = vmatpush.msra.mxu0 %v143_v14  ;;  %v115_v43 = vadd.f32 %v114_v34, %v113_v37  ;;  %v186_v62 = vld [vmem:[#allocation2 + $0x38] sm:$0xff]  ;;  %v135_v63 = vld [vmem:[%s4072_s1 + $0x10] sm:$0xff]  ;;  %v134_v3 = vld [vmem:[%s4072_s1 + $0x8] sm:$0xff] }
  0x1b   :  { %v102_v42 = vadd.f32 %v101_v33, %v100_v36  ;;  %198 = vmatpush.msra.mxu1 %v191_v38  ;;  %v127_v50 = vmul.f32 %v3880_v5, %v126_v41  ;;  %v185_v2 = vld [vmem:[#allocation2 + $0x30] sm:$0xff]  ;;  %v184_v8 = vld [vmem:[#allocation2 + $0x28] sm:$0xff]  ;;  %v133_v9 = vld [vmem:[%s4072_s1] sm:$0xff] }
  0x1c   :  { %164 = vmatpush.msra.mxu0 %v142_v23  ;;  %v117_v47 = vadd.f32 %v116_v40, %v115_v43  ;;  %v3686_v12 = vld [vmem:[%s4076_s5] ss:$0 sm:$0xff]  ;;  %v182_v15 = vld [vmem:[#allocation2 + $0x18] sm:$0xff]  ;;  %v181_v22 = vld [vmem:[#allocation2 + $0x10] sm:$0xff] }
  0x1d   :  { %v103_v46 = vrot.slane %v102_v42, 4  ;;  %199 = vmatpush.msra.mxu1 %v190_v44  ;;  %v128_v59 = vadd.f32 %v3880_v5, %v127_v50  ;;  %v183_v13 = vld [vmem:[#allocation2 + $0x20] sm:$0xff]  ;;  %v180_v23 = vld [vmem:[#allocation2 + $0x8] sm:$0xff] }
  0x1e   :  { %165 = vmatpush.msra.mxu0 %v141_v32  ;;  %v118_v52 = vrot.slane %v117_v47, 4  ;;  %v179_v24 = vld [vmem:[#allocation2] sm:$0xff] }
  0x1f   :  { %v104_v51 = vadd.f32 %v103_v46, %v102_v42  ;;  %200 = vmatpush.msra.mxu1 %v189_v48  ;;  %v130_v4 = vsel %vm129_vm1, %v3880_v5, %v128_v59  ;;  %v2620_v25 = vld [vmem:[#allocation5 + $0x1c0] sm:$0xf]  ;;  %v3474_v27 = vld [vmem:[#allocation5 + $0x1c4] sm:$0xf] }
  0x20   :  { %166 = vmatpush.msra.mxu0 %v140_v39  ;;  %v119_v56 = vadd.f32 %v118_v52, %v117_v47  ;;  %v3478_v26 = vld [vmem:[#allocation5 + $0x1dc] sm:$0xf0]  ;;  %v2622_v29 = vld [vmem:[#allocation5 + $0x1e0] sm:$0xf0] }
  0x21   :  { %v105_v55 = vrot.slane %v104_v51, 2  ;;  %201 = vmatpush.msra.mxu1 %v188_v53  ;;  %v2621_v28 = vor.u32 %v3478_v26, %v2620_v25  ;;  %v2588_v30 = vld [vmem:[#allocation5 + $0x180] sm:$0xf]  ;;  %v2625_v32 = vor.u32 %v3474_v27, %v2622_v29  ;;  %v3466_v33 = vld [vmem:[#allocation5 + $0x184] sm:$0xf] }
  0x22   :  { %167 = vmatpush.msra.mxu0 %v139_v45  ;;  %v120_v61 = vrot.slane %v119_v56, 2  ;;  %v3470_v31 = vld [vmem:[#allocation5 + $0x19c] sm:$0xf0]  ;;  %v2590_v34 = vld [vmem:[#allocation5 + $0x1a0] sm:$0xf0] }
  0x23   :  { %v106_v60 = vadd.f32 %v105_v55, %v104_v51  ;;  %202 = vmatpush.msra.mxu1 %v187_v57  ;;  %1427 = vmatpush.bf16.msra.mxu2 %v2621_v28  ;;  %v2589_v35 = vor.u32 %v3470_v31, %v2588_v30  ;;  %v2593_v36 = vor.u32 %v3466_v33, %v2590_v34  ;;  %v2556_v37 = vld [vmem:[#allocation5 + $0x140] sm:$0xf]  ;;  %v3458_v39 = vld [vmem:[#allocation5 + $0x144] sm:$0xf]  ;;  %v2884_v31 = vld [vmem:[#allocation5 + $0x3c8] sm:$0xf] }
  0x24   :  { %168 = vmatpush.msra.mxu0 %v138_v49  ;;  %v121_v1 = vadd.f32 %v120_v61, %v119_v56  ;;  %v3462_v38 = vld [vmem:[#allocation5 + $0x15c] sm:$0xf0]  ;;  %v2558_v40 = vld [vmem:[#allocation5 + $0x160] sm:$0xf0] }
  0x25   :  { %v107_v0 = vrot.slane %v106_v60, 1  ;;  %203 = vmatpush.msra.mxu1 %v186_v62  ;;  %v2557_v41 = vor.u32 %v3462_v38, %v2556_v37  ;;  %v2561_v42 = vor.u32 %v3458_v39, %v2558_v40  ;;  %v2524_v43 = vld [vmem:[#allocation5 + $0x100] sm:$0xf]  ;;  %v3450_v45 = vld [vmem:[#allocation5 + $0x104] sm:$0xf] }
  0x26   :  { %169 = vmatpush.msra.mxu0 %v137_v54  ;;  %v122_v7 = vrot.slane %v121_v1, 1  ;;  %v3454_v44 = vld [vmem:[#allocation5 + $0x11c] sm:$0xf0]  ;;  %v2526_v46 = vld [vmem:[#allocation5 + $0x120] sm:$0xf0] }
  0x27   :  { %v108_v6 = vadd.f32 %v107_v0, %v106_v60  ;;  %204 = vmatpush.msra.mxu1 %v185_v2  ;;  %1428 = vmatpush.bf16.msra.mxu2 %v2589_v35  ;;  %v2876_v47 = vld [vmem:[#allocation5 + $0x3c0] sm:$0xf]  ;;  %v2525_v49 = vor.u32 %v3454_v44, %v2524_v43  ;;  %v2529_v51 = vor.u32 %v3450_v45, %v2526_v46  ;;  %v3442_v56 = vld [vmem:[#allocation5 + $0xc4] sm:$0xf]  ;;  %v3543_v35 = vld [vmem:[#allocation5 + $0x3e4] sm:$0xf0] }
  0x28   :  { %170 = vmatpush.msra.mxu0 %v136_v58  ;;  %v123_v10 = vadd.f32 %v122_v7, %v121_v1  ;;  %v3685_v48 = vld [vmem:[%s4075_s4] ss:$0 sm:$0xff]  ;;  %v2494_v57 = vld [vmem:[#allocation5 + $0xe0] sm:$0xf0]  ;;  %v2852_v44 = vld [vmem:[#allocation5 + $0x388] sm:$0xf]  ;;  %v2885_v46 = vor.u32 %v3543_v35, %v2884_v31 }
  0x29   :  { %v3963_v11 = vmul.f32 %v130_v4, %v108_v6  ;;  %205 = vmatpush.msra.mxu1 %v184_v8  ;;  %v3542_v50 = vld [vmem:[#allocation5 + $0x3dc] sm:$0xf0]  ;;  %v2497_v0 = vor.u32 %v3442_v56, %v2494_v57  ;;  %v3538_v27 = vld [vmem:[#allocation5 + $0x3c4] sm:$0xf] }
  0x2a   :  { %171 = vmatpush.msra.mxu0 %v135_v63  ;;  %v3968_v5 = vmul.f32 %v130_v4, %v123_v10  ;;  %v2492_v52 = vld [vmem:[#allocation5 + $0xc0] sm:$0xf]  ;;  %v2877_v54 = vor.u32 %v3542_v50, %v2876_v47  ;;  %v2462_v4 = vld [vmem:[#allocation5 + $0xa0] sm:$0xf0] }
  0x2b   :  { %v227_v14 = vadd.f32 %v3686_v12, %v3963_v11  ;;  %206 = vmatpush.msra.mxu1 %v183_v13  ;;  %1429 = vmatpush.bf16.msra.mxu2 %v2557_v41  ;;  %v3446_v53 = vld [vmem:[#allocation5 + $0xdc] sm:$0xf0]  ;;  %v3985_v10 = vadd.f32 %v3685_v48, %v3963_v11  ;;  %v2878_v28 = vld [vmem:[#allocation5 + $0x3e0] sm:$0xf0] }
  0x2c   :  { %172 = vmatpush.msra.mxu0 %v134_v3  ;;  %v156_v16 = vsel %vm155_vm2, %v3968_v5, %v3963_v11  ;;  %v228_v17 = vadd.f32 %v3686_v12, %v3968_v5  ;;  %v2844_v55 = vld [vmem:[#allocation5 + $0x380] sm:$0xf]  ;;  %1440 = vmatpush.bf16.msra.mxu3 %v2877_v54  ;;  %v2493_v60 = vor.u32 %v3446_v53, %v2492_v52  ;;  %v3434_v3 = vld [vmem:[#allocation5 + $0x84] sm:$0xf] }
  0x2d   :  { %207 = vmatpush.msra.mxu1 %v182_v15  ;;  %v229_v18 = vmax.f32 %v227_v14, 0.0  ;;  %v3534_v58 = vld [vmem:[#allocation5 + $0x39c] sm:$0xf0]  ;;  %v3982_v63 = vadd.f32 %v3685_v48, %v3968_v5  ;;  %v2465_v13 = vor.u32 %v3434_v3, %v2462_v4  ;;  %v3426_v15 = vld [vmem:[#allocation5 + $0x44] sm:$0xf]  ;;  %v221_v11 = vmax.f32 %v3985_v10, 0.0 }
  0x2e   :  { %173 = vmatpush.msra.mxu0 %v133_v9  ;;  %v230_v19 = vmax.f32 %v228_v17, 0.0  ;;  %v2845_v59 = vor.u32 %v3534_v58, %v2844_v55  ;;  %v2812_v61 = vld [vmem:[#allocation5 + $0x340] sm:$0xf]  ;;  %v3418_v29 = vld [vmem:[#allocation5 + $0x4] sm:$0xf]  ;;  %v2881_v40 = vor.u32 %v3538_v27, %v2878_v28 }
  0x2f   :  { %174 = vmatmul.f32.vlgmr.msra.gmra.mxu0 %v156_v16  ;;  %208 = vmatpush.msra.mxu1 %v181_v22  ;;  %v3526_v62 = vld [vmem:[#allocation5 + $0x35c] sm:$0xf0]  ;;  %v222_v12 = vmax.f32 %v3982_v63, 0.0  ;;  %v2430_v16 = vld [vmem:[#allocation5 + $0x60] sm:$0xf0] }
  0x30   :  { %v246_v20 = vrot.slane %v230_v19, 7  ;;  %1430 = vmatpush.bf16.msra.mxu2 %v2525_v49  ;;  %v2460_v1 = vld [vmem:[#allocation5 + $0x80] sm:$0xf]  ;;  %1441 = vmatpush.bf16.msra.mxu3 %v2845_v59  ;;  %v2813_v6 = vor.u32 %v3526_v62, %v2812_v61  ;;  %v2398_v30 = vld [vmem:[#allocation5 + $0x20] sm:$0xf0] }
  0x31   :  { %209 = vmatpush.msra.mxu1 %v180_v23  ;;  %v3438_v2 = vld [vmem:[#allocation5 + $0x9c] sm:$0xf0]  ;;  %v241_v23 = vrot.slane %v222_v12, 7  ;;  %v2401_v41 = vor.u32 %v3418_v29, %v2398_v30  ;;  %v2846_v43 = vld [vmem:[#allocation5 + $0x3a0] sm:$0xf0] }
  0x32   :  { %v3976_v21 = vsel %vm155_vm2, %v246_v20, %v229_v18  ;;  %v2461_v7 = vor.u32 %v3438_v2, %v2460_v1  ;;  %v2780_v8 = vld [vmem:[#allocation5 + $0x300] sm:$0xf]  ;;  %v3522_v56 = vld [vmem:[#allocation5 + $0x344] sm:$0xf]  ;;  %v2820_v61 = vld [vmem:[#allocation5 + $0x348] sm:$0xf] }
  0x33   :  { %210 = vmatpush.msra.mxu1 %v179_v24  ;;  %v3518_v9 = vld [vmem:[#allocation5 + $0x31c] sm:$0xf0]  ;;  %v2433_v24 = vor.u32 %v3426_v15, %v2430_v16  ;;  %v242_v38 = vsel %vm155_vm2, %v241_v23, %v221_v11  ;;  %v2814_v57 = vld [vmem:[#allocation5 + $0x360] sm:$0xf0]  ;;  %v3527_v62 = vld [vmem:[#allocation5 + $0x364] sm:$0xf0] }
  0x34   :  { %1431 = vmatpush.bf16.msra.mxu2 %v2493_v60  ;;  %v2428_v5 = vld [vmem:[#allocation5 + $0x40] sm:$0xf]  ;;  %1442 = vmatpush.bf16.msra.mxu3 %v2813_v6  ;;  %v2781_v17 = vor.u32 %v3518_v9, %v2780_v8  ;;  %v3993_v50 = vpack.c.bf16 %v242_v38, %v242_v38  ;;  %v2817_v6 = vor.u32 %v3522_v56, %v2814_v57  ;;  %v3134_v8 = vld [vmem:[#allocation5 + $0x5e0] sm:$0xf0]  ;;  %v2788_v15 = vld [vmem:[#allocation5 + $0x308] sm:$0xf] }
  0x35   :  { %1466 = vmatpush.bf16.msrb.mxu1 %v2625_v32  ;;  %v3430_v14 = vld [vmem:[#allocation5 + $0x5c] sm:$0xf0]  ;;  %v3514_v12 = vld [vmem:[#allocation5 + $0x304] sm:$0xf]  ;;  %v2756_v29 = vld [vmem:[#allocation5 + $0x2c8] sm:$0xf] }
  0x36   :  { %v3687_v18 = vld [vmem:[%s4073_s2] ss:$0 sm:$0xff]  ;;  %v2429_v19 = vor.u32 %v3430_v14, %v2428_v5  ;;  %v2821_v14 = vor.u32 %v3527_v62, %v2820_v61  ;;  %v3594_v11 = vld [vmem:[#allocation5 + $0x584] sm:$0xf]  ;;  %v3511_v30 = vld [vmem:[#allocation5 + $0x2e4] sm:$0xf0] }
  0x37   :  { %v2748_v20 = vld [vmem:[#allocation5 + $0x2c0] sm:$0xf]  ;;  %v3102_v23 = vld [vmem:[#allocation5 + $0x5a0] sm:$0xf0] }
  0x38   :  { %1432 = vmatpush.bf16.msra.mxu2 %v2461_v7  ;;  %v3510_v22 = vld [vmem:[#allocation5 + $0x2dc] sm:$0xf0]  ;;  %1443 = vmatpush.bf16.msra.mxu3 %v2781_v17  ;;  %v3602_v7 = vld [vmem:[#allocation5 + $0x5c4] sm:$0xf]  ;;  %v3519_v17 = vld [vmem:[#allocation5 + $0x324] sm:$0xf0]  ;;  %v3105_v31 = vor.u32 %v3594_v11, %v3102_v23 }
  0x39   :  { %1467 = vmatpush.bf16.msrb.mxu1 %v2593_v36  ;;  %v2396_v25 = vld [vmem:[#allocation5] sm:$0xf]  ;;  %v2749_v32 = vor.u32 %v3510_v22, %v2748_v20  ;;  %v2789_v28 = vor.u32 %v3519_v17, %v2788_v15  ;;  %v3586_v35 = vld [vmem:[#allocation5 + $0x544] sm:$0xf]  ;;  %v3595_v11 = vld [vmem:[#allocation5 + $0x58c] sm:$0xf] }
  0x3a   :  { %v3422_v26 = vld [vmem:[#allocation5 + $0x1c] sm:$0xf0]  ;;  %v3482_v61 = vld [vmem:[#allocation5 + $0x204] sm:$0xf] }
  0x3b   :  { %v2397_v34 = vor.u32 %v3422_v26, %v2396_v25  ;;  %v2716_v36 = vld [vmem:[#allocation5 + $0x280] sm:$0xf]  ;;  %v3506_v25 = vld [vmem:[#allocation5 + $0x2c4] sm:$0xf] }
  0x3c   :  { %1433 = vmatpush.bf16.msra.mxu2 %v2429_v19  ;;  %v3502_v37 = vld [vmem:[#allocation5 + $0x29c] sm:$0xf0]  ;;  %1444 = vmatpush.bf16.msra.mxu3 %v2749_v32  ;;  %v2750_v26 = vld [vmem:[#allocation5 + $0x2e0] sm:$0xf0] }
  0x3d   :  { %1468 = vmatpush.bf16.msrb.mxu1 %v2561_v42  ;;  %v3530_v42 = vld [vmem:[#allocation5 + $0x384] sm:$0xf]  ;;  %v2717_v47 = vor.u32 %v3502_v37, %v2716_v36  ;;  %v3132_v48 = vld [vmem:[#allocation5 + $0x5c0] sm:$0xf] }
  0x3e   :  { %v3606_v49 = vld [vmem:[#allocation5 + $0x5dc] sm:$0xf0]  ;;  %v2849_v55 = vor.u32 %v3530_v42, %v2846_v43  ;;  %v3070_v36 = vld [vmem:[#allocation5 + $0x560] sm:$0xf0] }
  0x3f   :  { %v2684_v52 = vld [vmem:[#allocation5 + $0x240] sm:$0xf]  ;;  %v3133_v54 = vor.u32 %v3606_v49, %v3132_v48  ;;  %v3498_v37 = vld [vmem:[#allocation5 + $0x284] sm:$0xf]  ;;  %v3073_v42 = vor.u32 %v3586_v35, %v3070_v36  ;;  %v3471_v35 = vld [vmem:[#allocation5 + $0x1a4] sm:$0xf0] }
  0x40   :  { %1434 = vmatpush.bf16.msra.mxu2 %v2397_v34  ;;  %v3494_v53 = vld [vmem:[#allocation5 + $0x25c] sm:$0xf0]  ;;  %1445 = vmatpush.bf16.msra.mxu3 %v2717_v47  ;;  %v2753_v34 = vor.u32 %v3506_v25, %v2750_v26  ;;  %v3038_v47 = vld [vmem:[#allocation5 + $0x520] sm:$0xf0]  ;;  %v2628_v25 = vld [vmem:[#allocation5 + $0x1c8] sm:$0xf] }
  0x41   :  { %1469 = vmatpush.bf16.msrb.mxu1 %v2529_v51  ;;  %v3535_v51 = vld [vmem:[#allocation5 + $0x3a4] sm:$0xf0]  ;;  %1453 = vmatpush.bf16.msrb.mxu0 %v3133_v54  ;;  %v3100_v58 = vld [vmem:[#allocation5 + $0x580] sm:$0xf]  ;;  %v3490_v48 = vld [vmem:[#allocation5 + $0x244] sm:$0xf] }
  0x42   :  { %v3598_v59 = vld [vmem:[#allocation5 + $0x59c] sm:$0xf0]  ;;  %v2853_v60 = vor.u32 %v3535_v51, %v2852_v44  ;;  %v2686_v49 = vld [vmem:[#allocation5 + $0x260] sm:$0xf0]  ;;  %v3495_v54 = vld [vmem:[#allocation5 + $0x264] sm:$0xf0] }
  0x43   :  { %v3101_v1 = vor.u32 %v3598_v59, %v3100_v58  ;;  %v2652_v2 = vld [vmem:[#allocation5 + $0x200] sm:$0xf]  ;;  %1435 = vmatmul.bf16.vlgmr.msra.gmra.mxu2 %v3993_v50  ;;  %v2689_v58 = vor.u32 %v3490_v48, %v2686_v49  ;;  %v3570_v59 = vld [vmem:[#allocation5 + $0x4c4] sm:$0xf]  ;;  %v3479_v26 = vld [vmem:[#allocation5 + $0x1e4] sm:$0xf0] }
  0x44   :  { %1479 = vmatpush.bf16.msrb.mxu2 %v2881_v40  ;;  %v3486_v3 = vld [vmem:[#allocation5 + $0x21c] sm:$0xf0]  ;;  %v2724_v40 = vld [vmem:[#allocation5 + $0x288] sm:$0xf]  ;;  %v2654_v62 = vld [vmem:[#allocation5 + $0x220] sm:$0xf0] }
  0x45   :  { %1470 = vmatpush.bf16.msrb.mxu1 %v2497_v0  ;;  %v2685_v0 = vor.u32 %v3494_v53, %v2684_v52  ;;  %v3068_v4 = vld [vmem:[#allocation5 + $0x540] sm:$0xf]  ;;  %1454 = vmatpush.bf16.msrb.mxu0 %v3101_v1  ;;  %v2653_v16 = vor.u32 %v3486_v3, %v2652_v2  ;;  %v2692_v53 = vld [vmem:[#allocation5 + $0x248] sm:$0xf]  ;;  %v2974_v15 = vld [vmem:[#allocation5 + $0x4a0] sm:$0xf0] }
  0x46   :  { %v3590_v9 = vld [vmem:[#allocation5 + $0x55c] sm:$0xf0]  ;;  %v2693_v2 = vor.u32 %v3495_v54, %v2692_v53  ;;  %v3487_v3 = vld [vmem:[#allocation5 + $0x224] sm:$0xf0]  ;;  %v3046_v54 = vld [vmem:[#allocation5 + $0x528] sm:$0xf0] }
  0x47   :  { %v3069_v5 = vor.u32 %v3590_v9, %v3068_v4  ;;  %1446 = vmatpush.bf16.msra.mxu3 %v2685_v0  ;;  %v3036_v19 = vld [vmem:[#allocation5 + $0x500] sm:$0xf]  ;;  %v2660_v0 = vld [vmem:[#allocation5 + $0x208] sm:$0xf] }
  0x48   :  { %1480 = vmatpush.bf16.msrb.mxu2 %v2849_v55  ;;  %v3582_v20 = vld [vmem:[#allocation5 + $0x51c] sm:$0xf0]  ;;  %v3140_v4 = vld [vmem:[#allocation5 + $0x5c8] sm:$0xf] }
  0x49   :  { %1471 = vmatpush.bf16.msrb.mxu1 %v2465_v13  ;;  %v2782_v13 = vld [vmem:[#allocation5 + $0x320] sm:$0xf0]  ;;  %1455 = vmatpush.bf16.msrb.mxu0 %v3069_v5  ;;  %v3037_v27 = vor.u32 %v3582_v20, %v3036_v19  ;;  %v3004_v32 = vld [vmem:[#allocation5 + $0x4c0] sm:$0xf]  ;;  %v3142_v5 = vld [vmem:[#allocation5 + $0x5e8] sm:$0xf0] }
  0x4a   :  { %v2785_v22 = vor.u32 %v3514_v12, %v2782_v13  ;;  %v2972_v43 = vld [vmem:[#allocation5 + $0x480] sm:$0xf]  ;;  %v2657_v13 = vor.u32 %v3482_v61, %v2654_v62  ;;  %v3108_v19 = vld [vmem:[#allocation5 + $0x588] sm:$0xf] }
  0x4b   :  { %1447 = vmatpush.bf16.msra.mxu3 %v2653_v16  ;;  %v3566_v44 = vld [vmem:[#allocation5 + $0x49c] sm:$0xf0]  ;;  %v3599_v20 = vld [vmem:[#allocation5 + $0x5a4] sm:$0xf0] }
  0x4c   :  { %1481 = vmatpush.bf16.msrb.mxu2 %v2817_v6  ;;  %v2973_v51 = vor.u32 %v3566_v44, %v2972_v43  ;;  %v2940_v56 = vld [vmem:[#allocation5 + $0x440] sm:$0xf]  ;;  %v3607_v6 = vld [vmem:[#allocation5 + $0x5e4] sm:$0xf0] }
  0x4d   :  { %1472 = vmatpush.bf16.msrb.mxu1 %v2433_v24  ;;  %v3999_v24 = vpack.c.bf16 %v3976_v21, %v3976_v21  ;;  %v2718_v21 = vld [vmem:[#allocation5 + $0x2a0] sm:$0xf0]  ;;  %1456 = vmatpush.bf16.msrb.mxu0 %v3037_v27  ;;  %v3558_v57 = vld [vmem:[#allocation5 + $0x45c] sm:$0xf0]  ;;  %v3141_v16 = vor.u32 %v3607_v6, %v3140_v4  ;;  %v3110_v27 = vld [vmem:[#allocation5 + $0x5a8] sm:$0xf0] }
  0x4e   :  { %v2941_v1 = vor.u32 %v3558_v57, %v2940_v56  ;;  %v2908_v9 = vld [vmem:[#allocation5 + $0x400] sm:$0xf]  ;;  %v3113_v36 = vor.u32 %v3595_v11, %v3110_v27  ;;  %v3463_v43 = vld [vmem:[#allocation5 + $0x164] sm:$0xf0]  ;;  %v2950_v27 = vld [vmem:[#allocation5 + $0x468] sm:$0xf0] }
  0x4f   :  { %1448 = vmatmul.bf16.vlgmr.msra.gmra.mxu3 %v3999_v24  ;;  %v3550_v12 = vld [vmem:[#allocation5 + $0x41c] sm:$0xf0]  ;;  %v3583_v48 = vld [vmem:[#allocation5 + $0x524] sm:$0xf0] }
  0x50   :  { %1482 = vmatpush.bf16.msrb.mxu2 %v2785_v22  ;;  %v2909_v17 = vor.u32 %v3550_v12, %v2908_v9  ;;  %v2532_v56 = vld [vmem:[#allocation5 + $0x108] sm:$0xf]  ;;  %v3459_v9 = vld [vmem:[#allocation5 + $0x14c] sm:$0xf] }
  0x51   :  { %1473 = vmatpush.bf16.msrb.mxu1 %v2401_v41  ;;  %v3503_v41 = vld [vmem:[#allocation5 + $0x2a4] sm:$0xf0]  ;;  %v2566_v12 = vld [vmem:[#allocation5 + $0x168] sm:$0xf0] }
  0x52   :  { %v2725_v52 = vor.u32 %v3503_v41, %v2724_v40  ;;  %v2910_v41 = vld [vmem:[#allocation5 + $0x420] sm:$0xf0]  ;;  %v3455_v57 = vld [vmem:[#allocation5 + $0x124] sm:$0xf0] }
  0x53   :  { %v3012_v61 = vld [vmem:[#allocation5 + $0x4c8] sm:$0xf] }
  0x54   :  { %1483 = vmatpush.bf16.msrb.mxu2 %v2753_v34  ;;  %v3591_v34 = vld [vmem:[#allocation5 + $0x564] sm:$0xf0] }
  0x55   :  { %v3575_v62 = vld [vmem:[#allocation5 + $0x4e4] sm:$0xf0] }
  0x56   :  { %v2500_v6 = vld [vmem:[#allocation5 + $0xc8] sm:$0xf] }
  0x57   :  { %v2948_v11 = vld [vmem:[#allocation5 + $0x448] sm:$0xf] }
  0xac   :  { %v175_v33 = vpop.f32.mrf.mxu0 }
  0xad   :  { %v176_v39 = vadd.f32 %v3687_v18, %v175_v33  ;;  %v3137_v18 = vor.u32 %v3602_v7, %v3134_v8  ;;  %v3574_v33 = vld [vmem:[#allocation5 + $0x4dc] sm:$0xf0]  ;;  %v3603_v7 = vld [vmem:[#allocation5 + $0x5cc] sm:$0xf] }
  0xae   :  { %v3005_v38 = vor.u32 %v3574_v33, %v3004_v32  ;;  %v3145_v22 = vor.u32 %v3603_v7, %v3142_v5  ;;  %v2596_v32 = vld [vmem:[#allocation5 + $0x188] sm:$0xf] }
  0xaf   :  { %v178_v45 = vmax.f32 %v176_v39, 0.0  ;;  %1492 = vmatpush.bf16.msrb.mxu3 %v3137_v18  ;;  %v2757_v39 = vor.u32 %v3511_v30, %v2756_v29  ;;  %v2661_v18 = vor.u32 %v3487_v3, %v2660_v0  ;;  %v2942_v29 = vld [vmem:[#allocation5 + $0x460] sm:$0xf0]  ;;  %v2629_v30 = vor.u32 %v3479_v26, %v2628_v25  ;;  %v3076_v33 = vld [vmem:[#allocation5 + $0x548] sm:$0xf] }
  0xb0   :  { %1457 = vmatpush.bf16.msrb.mxu0 %v3005_v38  ;;  %v2597_v40 = vor.u32 %v3471_v35, %v2596_v32  ;;  %v3077_v44 = vor.u32 %v3591_v34, %v3076_v33  ;;  %v2533_v0 = vor.u32 %v3455_v57, %v2532_v56  ;;  %v3014_v3 = vld [vmem:[#allocation5 + $0x4e8] sm:$0xf0]  ;;  %v3447_v7 = vld [vmem:[#allocation5 + $0xe4] sm:$0xf0]  ;;  %v2636_v35 = vld [vmem:[#allocation5 + $0x1d0] sm:$0xf] }
  0xb1   :  { %211 = vmatmul.f32.vlgmr.msra.gmra.mxu1 %v178_v45  ;;  %v2721_v45 = vor.u32 %v3498_v37, %v2718_v21  ;;  %v3587_v37 = vld [vmem:[#allocation5 + $0x54c] sm:$0xf]  ;;  %v3567_v5 = vld [vmem:[#allocation5 + $0x4a4] sm:$0xf0]  ;;  %v2540_v57 = vld [vmem:[#allocation5 + $0x110] sm:$0xf] }
  0xb2   :  { %1518 = vmatpush.bf16.msra.mxu1 %v2885_v46  ;;  %v3578_v46 = vld [vmem:[#allocation5 + $0x504] sm:$0xf]  ;;  %v3078_v21 = vld [vmem:[#allocation5 + $0x568] sm:$0xf0]  ;;  %v2916_v32 = vld [vmem:[#allocation5 + $0x408] sm:$0xf] }
  0xb3   :  { %1493 = vmatpush.bf16.msrb.mxu3 %v3105_v31  ;;  %v3041_v55 = vor.u32 %v3578_v46, %v3038_v47  ;;  %1484 = vmatpush.bf16.msrb.mxu2 %v2721_v45  ;;  %v3109_v31 = vor.u32 %v3599_v20, %v3108_v19  ;;  %v3475_v45 = vld [vmem:[#allocation5 + $0x1cc] sm:$0xf]  ;;  %v3044_v47 = vld [vmem:[#allocation5 + $0x508] sm:$0xf] }
  0xb4   :  { %1458 = vmatpush.bf16.msrb.mxu0 %v2973_v51  ;;  %v2630_v46 = vld [vmem:[#allocation5 + $0x1e8] sm:$0xf0]  ;;  %v3081_v51 = vor.u32 %v3587_v37, %v3078_v21  ;;  %v3551_v33 = vld [vmem:[#allocation5 + $0x424] sm:$0xf0] }
  0xb5   :  { %v3451_v20 = vld [vmem:[#allocation5 + $0x10c] sm:$0xf] }
  0xb6   :  { %1519 = vmatpush.bf16.msra.mxu1 %v2853_v60  ;;  %v3006_v60 = vld [vmem:[#allocation5 + $0x4e0] sm:$0xf0]  ;;  %v3555_v26 = vld [vmem:[#allocation5 + $0x44c] sm:$0xf] }
  0xb7   :  { %1494 = vmatpush.bf16.msrb.mxu3 %v3073_v42  ;;  %v3009_v8 = vor.u32 %v3570_v59, %v3006_v60  ;;  %1485 = vmatpush.bf16.msrb.mxu2 %v2689_v58  ;;  %v2564_v42 = vld [vmem:[#allocation5 + $0x148] sm:$0xf]  ;;  %v3045_v58 = vor.u32 %v3583_v48, %v3044_v47  ;;  %v3467_v59 = vld [vmem:[#allocation5 + $0x18c] sm:$0xf]  ;;  %v2953_v34 = vor.u32 %v3555_v26, %v2950_v27  ;;  %v3468_v47 = vld [vmem:[#allocation5 + $0x194] sm:$0xf] }
  0xb8   :  { %1459 = vmatpush.bf16.msrb.mxu0 %v2941_v1  ;;  %v2565_v49 = vor.u32 %v3463_v43, %v2564_v42  ;;  %v2598_v60 = vld [vmem:[#allocation5 + $0x1a8] sm:$0xf0]  ;;  %v2606_v48 = vld [vmem:[#allocation5 + $0x1b0] sm:$0xf0]  ;;  %v2444_v27 = vld [vmem:[#allocation5 + $0x50] sm:$0xf] }
  0xb9   :  { %1474 = vmatmul.bf16.vlgmr.msrb.gmra.mxu1 %v3993_v50  ;;  %v2601_v4 = vor.u32 %v3467_v59, %v2598_v60  ;;  %v3547_v37 = vld [vmem:[#allocation5 + $0x40c] sm:$0xf]  ;;  %v3452_v60 = vld [vmem:[#allocation5 + $0x114] sm:$0xf] }
  0xba   :  { %1520 = vmatpush.bf16.msra.mxu1 %v2821_v14  ;;  %v3562_v14 = vld [vmem:[#allocation5 + $0x484] sm:$0xf]  ;;  %v2918_v21 = vld [vmem:[#allocation5 + $0x428] sm:$0xf0] }
  0xbb   :  { %1495 = vmatpush.bf16.msrb.mxu3 %v3041_v55  ;;  %v2977_v23 = vor.u32 %v3562_v14, %v2974_v15  ;;  %1486 = vmatpush.bf16.msrb.mxu2 %v2657_v13  ;;  %v2633_v55 = vor.u32 %v3475_v45, %v2630_v46  ;;  %v2980_v13 = vld [vmem:[#allocation5 + $0x488] sm:$0xf]  ;;  %v2501_v14 = vor.u32 %v3447_v7, %v2500_v6  ;;  %v3472_v45 = vld [vmem:[#allocation5 + $0x1ac] sm:$0xf0]  ;;  %v2438_v26 = vld [vmem:[#allocation5 + $0x68] sm:$0xf0] }
  0xbc   :  { %1460 = vmatpush.bf16.msrb.mxu0 %v2909_v17  ;;  %v2982_v17 = vld [vmem:[#allocation5 + $0x4a8] sm:$0xf0]  ;;  %v2981_v19 = vor.u32 %v3567_v5, %v2980_v13  ;;  %v2921_v43 = vor.u32 %v3547_v37, %v2918_v21 }
  0xbd   :  { %v2470_v5 = vld [vmem:[#allocation5 + $0xa8] sm:$0xf0] }
  0xbe   :  { %1521 = vmatpush.bf16.msra.mxu1 %v2789_v28  ;;  %v3554_v28 = vld [vmem:[#allocation5 + $0x444] sm:$0xf]  ;;  %1487 = vmatmul.bf16.vlgmr.msrb.gmra.mxu2 %v3999_v24  ;;  %v2406_v21 = vld [vmem:[#allocation5 + $0x28] sm:$0xf0] }
  0xbf   :  { %1496 = vmatpush.bf16.msrb.mxu3 %v3009_v8  ;;  %1531 = vmatpush.bf16.msra.mxu2 %v3141_v16  ;;  %v2945_v38 = vor.u32 %v3554_v28, %v2942_v29  ;;  %v3013_v8 = vor.u32 %v3575_v62, %v3012_v61  ;;  %v3563_v16 = vld [vmem:[#allocation5 + $0x48c] sm:$0xf]  ;;  %v2542_v61 = vld [vmem:[#allocation5 + $0x130] sm:$0xf0] }
  0xc0   :  { %1505 = vmatpush.bf16.msra.mxu0 %v2629_v30  ;;  %v2985_v25 = vor.u32 %v3563_v16, %v2982_v17  ;;  %v3443_v30 = vld [vmem:[#allocation5 + $0xcc] sm:$0xf] }
  0xc2   :  { %1522 = vmatpush.bf16.msra.mxu1 %v2757_v39  ;;  %v3546_v39 = vld [vmem:[#allocation5 + $0x404] sm:$0xf] }
  0xc3   :  { %1497 = vmatpush.bf16.msrb.mxu3 %v2977_v23  ;;  %1532 = vmatpush.bf16.msra.mxu2 %v3109_v31  ;;  %v2913_v53 = vor.u32 %v3546_v39, %v2910_v41  ;;  %v3559_v23 = vld [vmem:[#allocation5 + $0x464] sm:$0xf0]  ;;  %v2502_v31 = vld [vmem:[#allocation5 + $0xe8] sm:$0xf0]  ;;  %v2917_v39 = vor.u32 %v3551_v33, %v2916_v32  ;;  %v2638_v41 = vld [vmem:[#allocation5 + $0x1f0] sm:$0xf0] }
  0xc4   :  { %1506 = vmatpush.bf16.msra.mxu0 %v2597_v40  ;;  %v2949_v29 = vor.u32 %v3559_v23, %v2948_v11  ;;  %v3476_v40 = vld [vmem:[#allocation5 + $0x1d4] sm:$0xf]  ;;  %v3431_v11 = vld [vmem:[#allocation5 + $0x64] sm:$0xf0]  ;;  %v3427_v23 = vld [vmem:[#allocation5 + $0x4c] sm:$0xf] }
  0xc5   :  { %v2641_v46 = vor.u32 %v3476_v40, %v2638_v41  ;;  %v2446_v32 = vld [vmem:[#allocation5 + $0x70] sm:$0xf0] }
  0xc6   :  { %1523 = vmatpush.bf16.msra.mxu1 %v2725_v52  ;;  %v3579_v52 = vld [vmem:[#allocation5 + $0x50c] sm:$0xf] }
  0xc7   :  { %1498 = vmatpush.bf16.msrb.mxu3 %v2945_v38  ;;  %1533 = vmatpush.bf16.msra.mxu2 %v3077_v44  ;;  %v3049_v1 = vor.u32 %v3579_v52, %v3046_v54  ;;  %v2505_v38 = vor.u32 %v3443_v30, %v2502_v31  ;;  %v2604_v44 = vld [vmem:[#allocation5 + $0x190] sm:$0xf]  ;;  %v3460_v54 = vld [vmem:[#allocation5 + $0x154] sm:$0xf] }
  0xc8   :  { %1507 = vmatpush.bf16.msra.mxu0 %v2565_v49  ;;  %v2605_v49 = vor.u32 %v3472_v45, %v2604_v44  ;;  %v3464_v52 = vld [vmem:[#allocation5 + $0x16c] sm:$0xf0]  ;;  %v3428_v31 = vld [vmem:[#allocation5 + $0x54] sm:$0xf] }
  0xc9   :  { %v2449_v33 = vor.u32 %v3428_v31, %v2446_v32  ;;  %v2796_v31 = vld [vmem:[#allocation5 + $0x310] sm:$0xf] }
  0xca   :  { %1524 = vmatpush.bf16.msra.mxu1 %v2693_v2  ;;  %v3571_v2 = vld [vmem:[#allocation5 + $0x4cc] sm:$0xf]  ;;  %v3520_v32 = vld [vmem:[#allocation5 + $0x32c] sm:$0xf0] }
  0xcb   :  { %1499 = vmatpush.bf16.msrb.mxu3 %v2913_v53  ;;  %1534 = vmatpush.bf16.msra.mxu2 %v3045_v58  ;;  %v3017_v15 = vor.u32 %v3571_v2, %v3014_v3  ;;  %v2609_v53 = vor.u32 %v3468_v47, %v2606_v48  ;;  %v3456_v58 = vld [vmem:[#allocation5 + $0x12c] sm:$0xf0]  ;;  %v2545_v2 = vor.u32 %v3452_v60, %v2542_v61  ;;  %v3444_v3 = vld [vmem:[#allocation5 + $0xd4] sm:$0xf]  ;;  %v3545_v60 = vld [vmem:[#allocation5 + $0x3f4] sm:$0xf0] }
  0xcc   :  { %1508 = vmatpush.bf16.msra.mxu0 %v2533_v0  ;;  %v2541_v62 = vor.u32 %v3456_v58, %v2540_v57  ;;  %v2508_v0 = vld [vmem:[#allocation5 + $0xd0] sm:$0xf]  ;;  %v3540_v57 = vld [vmem:[#allocation5 + $0x3d4] sm:$0xf] }
  0xcd   :  { %v2894_v58 = vld [vmem:[#allocation5 + $0x3f0] sm:$0xf0] }
  0xce   :  { %1525 = vmatpush.bf16.msra.mxu1 %v2661_v18  ;;  %v2569_v18 = vor.u32 %v3459_v9, %v2566_v12  ;;  %v3439_v9 = vld [vmem:[#allocation5 + $0xa4] sm:$0xf0]  ;;  %v3435_v12 = vld [vmem:[#allocation5 + $0x8c] sm:$0xf] }
  0xcf   :  { %1544 = vmatpush.bf16.msra.mxu3 %v2633_v55  ;;  %1535 = vmatpush.bf16.msra.mxu2 %v3013_v8  ;;  %v2574_v55 = vld [vmem:[#allocation5 + $0x170] sm:$0xf0]  ;;  %v2468_v8 = vld [vmem:[#allocation5 + $0x88] sm:$0xf]  ;;  %v2473_v16 = vor.u32 %v3435_v12, %v2470_v5  ;;  %v3537_v12 = vld [vmem:[#allocation5 + $0x3b4] sm:$0xf0] }
  0xd0   :  { %1509 = vmatpush.bf16.msra.mxu0 %v2501_v14  ;;  %v2577_v59 = vor.u32 %v3460_v54, %v2574_v55  ;;  %v2469_v13 = vor.u32 %v3439_v9, %v2468_v8  ;;  %v2476_v14 = vld [vmem:[#allocation5 + $0x90] sm:$0xf]  ;;  %v2862_v8 = vld [vmem:[#allocation5 + $0x3b0] sm:$0xf0]  ;;  %v2868_v9 = vld [vmem:[#allocation5 + $0x398] sm:$0xf] }
  0xd1   :  { %1526 = vmatmul.bf16.vlgmr.msra.gmra.mxu1 %v3999_v24 }
  0xd2   :  { %1570 = vmatpush.bf16.msrb.mxu1 %v3145_v22  ;;  %v2534_v22 = vld [vmem:[#allocation5 + $0x128] sm:$0xf0] }
  0xd3   :  { %1545 = vmatpush.bf16.msra.mxu3 %v2601_v4  ;;  %v2537_v28 = vor.u32 %v3451_v20, %v2534_v22  ;;  %1536 = vmatpush.bf16.msra.mxu2 %v2981_v19  ;;  %v2510_v4 = vld [vmem:[#allocation5 + $0xf0] sm:$0xf0]  ;;  %v2436_v22 = vld [vmem:[#allocation5 + $0x48] sm:$0xf] }
  0xd4   :  { %v2513_v7 = vor.u32 %v3444_v3, %v2510_v4  ;;  %v2478_v19 = vld [vmem:[#allocation5 + $0xb0] sm:$0xf0]  ;;  %1510 = vmatpush.bf16.msra.mxu0 %v2469_v13  ;;  %v2860_v4 = vld [vmem:[#allocation5 + $0x390] sm:$0xf] }
  0xd6   :  { %1571 = vmatpush.bf16.msrb.mxu1 %v3113_v36  ;;  %v3480_v36 = vld [vmem:[#allocation5 + $0x1ec] sm:$0xf0] }
  0xd7   :  { %1546 = vmatpush.bf16.msra.mxu3 %v2569_v18  ;;  %1537 = vmatpush.bf16.msra.mxu2 %v2949_v29  ;;  %v2637_v42 = vor.u32 %v3480_v36, %v2636_v35  ;;  %v3436_v18 = vld [vmem:[#allocation5 + $0x94] sm:$0xf]  ;;  %v2441_v29 = vor.u32 %v3427_v23, %v2438_v26  ;;  %v3423_v35 = vld [vmem:[#allocation5 + $0x24] sm:$0xf0]  ;;  %v3419_v36 = vld [vmem:[#allocation5 + $0xc] sm:$0xf] }
  0xd8   :  { %v2481_v20 = vor.u32 %v3436_v18, %v2478_v19  ;;  %v2409_v40 = vor.u32 %v3419_v36, %v2406_v21  ;;  %v2828_v18 = vld [vmem:[#allocation5 + $0x350] sm:$0xf]  ;;  %v3529_v23 = vld [vmem:[#allocation5 + $0x374] sm:$0xf0]  ;;  %v2797_v21 = vor.u32 %v3520_v32, %v2796_v31 }
  0xd9   :  { %v3528_v19 = vld [vmem:[#allocation5 + $0x36c] sm:$0xf0]  ;;  %v3521_v36 = vld [vmem:[#allocation5 + $0x334] sm:$0xf0] }
  0xda   :  { %1572 = vmatpush.bf16.msrb.mxu1 %v3081_v51  ;;  %v2572_v51 = vld [vmem:[#allocation5 + $0x150] sm:$0xf]  ;;  %v2829_v26 = vor.u32 %v3528_v19, %v2828_v18 }
  0xdb   :  { %1547 = vmatpush.bf16.msra.mxu3 %v2537_v28  ;;  %1538 = vmatpush.bf16.msra.mxu2 %v2917_v39  ;;  %v2573_v56 = vor.u32 %v3464_v52, %v2572_v51  ;;  %v3432_v28 = vld [vmem:[#allocation5 + $0x6c] sm:$0xf0]  ;;  %v3539_v51 = vld [vmem:[#allocation5 + $0x3cc] sm:$0xf] }
  0xdc   :  { %v2445_v30 = vor.u32 %v3432_v28, %v2444_v27  ;;  %v3424_v39 = vld [vmem:[#allocation5 + $0x2c] sm:$0xf0]  ;;  %v2886_v52 = vld [vmem:[#allocation5 + $0x3e8] sm:$0xf0] }
  0xdd   :  { %v3515_v27 = vld [vmem:[#allocation5 + $0x30c] sm:$0xf] }
  0xde   :  { %1573 = vmatpush.bf16.msrb.mxu1 %v3049_v1  ;;  %v3448_v1 = vld [vmem:[#allocation5 + $0xec] sm:$0xf0]  ;;  %v2790_v28 = vld [vmem:[#allocation5 + $0x328] sm:$0xf0] }
  0xdf   :  { %1548 = vmatpush.bf16.msra.mxu3 %v2505_v38  ;;  %1583 = vmatpush.bf16.msrb.mxu2 %v2637_v42  ;;  %v2509_v6 = vor.u32 %v3448_v1, %v2508_v0  ;;  %v2412_v38 = vld [vmem:[#allocation5 + $0x10] sm:$0xf]  ;;  %v3420_v42 = vld [vmem:[#allocation5 + $0x14] sm:$0xf] }
  0xe0   :  { %v2413_v41 = vor.u32 %v3424_v39, %v2412_v38  ;;  %v3507_v38 = vld [vmem:[#allocation5 + $0x2cc] sm:$0xf] }
  0xe1   :  { %v2758_v39 = vld [vmem:[#allocation5 + $0x2e8] sm:$0xf0] }
  0xe2   :  { %1574 = vmatpush.bf16.msrb.mxu1 %v3017_v15  ;;  %v3440_v15 = vld [vmem:[#allocation5 + $0xac] sm:$0xf0] }
  0xe3   :  { %1584 = vmatpush.bf16.msrb.mxu2 %v2605_v49  ;;  %v2477_v17 = vor.u32 %v3440_v15, %v2476_v14  ;;  %1549 = vmatpush.bf16.msra.mxu3 %v2473_v16  ;;  %v3523_v14 = vld [vmem:[#allocation5 + $0x34c] sm:$0xf] }
  0xe4   :  { %v2822_v15 = vld [vmem:[#allocation5 + $0x368] sm:$0xf0] }
  0xe6   :  { %1575 = vmatpush.bf16.msrb.mxu1 %v2985_v25  ;;  %v2437_v25 = vor.u32 %v3431_v11, %v2436_v22  ;;  %v2830_v22 = vld [vmem:[#allocation5 + $0x370] sm:$0xf0]  ;;  %v2836_v11 = vld [vmem:[#allocation5 + $0x358] sm:$0xf] }
  0xe7   :  { %1585 = vmatpush.bf16.msrb.mxu2 %v2573_v56  ;;  %1550 = vmatpush.bf16.msra.mxu3 %v2441_v29  ;;  %v3544_v56 = vld [vmem:[#allocation5 + $0x3ec] sm:$0xf0] }
  0xe8   :  { %1511 = vmatpush.bf16.msra.mxu0 %v2437_v25  ;;  %v2825_v25 = vor.u32 %v3523_v14, %v2822_v15  ;;  %v2668_v15 = vld [vmem:[#allocation5 + $0x210] sm:$0xf] }
  0xea   :  { %1576 = vmatpush.bf16.msrb.mxu1 %v2953_v34  ;;  %v2404_v34 = vld [vmem:[#allocation5 + $0x8] sm:$0xf] }
  0xeb   :  { %1586 = vmatpush.bf16.msrb.mxu2 %v2541_v62  ;;  %v2405_v37 = vor.u32 %v3423_v35, %v2404_v34  ;;  %1551 = vmatpush.bf16.msra.mxu3 %v2409_v40  ;;  %v2889_v62 = vor.u32 %v3539_v51, %v2886_v52  ;;  %v2798_v34 = vld [vmem:[#allocation5 + $0x330] sm:$0xf0]  ;;  %v2804_v35 = vld [vmem:[#allocation5 + $0x318] sm:$0xf]  ;;  %v3499_v51 = vld [vmem:[#allocation5 + $0x28c] sm:$0xf] }
  0xec   :  { %v2726_v52 = vld [vmem:[#allocation5 + $0x2a8] sm:$0xf0] }
  0xed   :  { %1512 = vmatpush.bf16.msra.mxu0 %v2405_v37  ;;  %v2793_v37 = vor.u32 %v3515_v27, %v2790_v28  ;;  %v3150_v28 = vld [vmem:[#allocation5 + $0x5f0] sm:$0xf0] }
  0xee   :  { %1577 = vmatpush.bf16.msrb.mxu1 %v2921_v43  ;;  %v2414_v43 = vld [vmem:[#allocation5 + $0x30] sm:$0xf0] }
  0xef   :  { %1587 = vmatpush.bf16.msrb.mxu2 %v2509_v6  ;;  %v2417_v44 = vor.u32 %v3420_v42, %v2414_v43  ;;  %v3536_v6 = vld [vmem:[#allocation5 + $0x3ac] sm:$0xf0] }
  0xf0   :  { %v2861_v5 = vor.u32 %v3536_v6, %v2860_v4  ;;  %v2764_v42 = vld [vmem:[#allocation5 + $0x2d0] sm:$0xf]  ;;  %v3492_v6 = vld [vmem:[#allocation5 + $0x254] sm:$0xf] }
  0xf1   :  { %v3512_v43 = vld [vmem:[#allocation5 + $0x2ec] sm:$0xf0] }
  0xf2   :  { %1622 = vmatpush.bf16.msra.mxu1 %v2641_v46  ;;  %v3496_v4 = vld [vmem:[#allocation5 + $0x26c] sm:$0xf0] }
  0xf3   :  { %1588 = vmatpush.bf16.msrb.mxu2 %v2477_v17  ;;  %v2869_v17 = vor.u32 %v3537_v12, %v2868_v9  ;;  %v3497_v9 = vld [vmem:[#allocation5 + $0x274] sm:$0xf0] }
  0xf6   :  { %1623 = vmatpush.bf16.msra.mxu1 %v2609_v53  ;;  %v2892_v53 = vld [vmem:[#allocation5 + $0x3d0] sm:$0xf] }
  0xf7   :  { %1589 = vmatpush.bf16.msrb.mxu2 %v2445_v30  ;;  %v2893_v1 = vor.u32 %v3544_v56, %v2892_v53  ;;  %v2837_v30 = vor.u32 %v3529_v23, %v2836_v11  ;;  %v3504_v56 = vld [vmem:[#allocation5 + $0x2ac] sm:$0xf0]  ;;  %v2676_v23 = vld [vmem:[#allocation5 + $0x218] sm:$0xf] }
  0xf8   :  { %v3608_v11 = vld [vmem:[#allocation5 + $0x5ec] sm:$0xf0] }
  0xfa   :  { %1624 = vmatpush.bf16.msra.mxu1 %v2577_v59  ;;  %v2900_v59 = vld [vmem:[#allocation5 + $0x3d8] sm:$0xf] }
  0xfb   :  { %1590 = vmatpush.bf16.msrb.mxu2 %v2413_v41  ;;  %v2901_v3 = vor.u32 %v3545_v60, %v2900_v59  ;;  %v2805_v41 = vor.u32 %v3521_v36, %v2804_v35  ;;  %v2740_v59 = vld [vmem:[#allocation5 + $0x298] sm:$0xf] }
  0xfc   :  { %v3505_v60 = vld [vmem:[#allocation5 + $0x2b4] sm:$0xf0] }
  0xfe   :  { %1625 = vmatpush.bf16.msra.mxu1 %v2545_v2  ;;  %v2854_v2 = vld [vmem:[#allocation5 + $0x3a8] sm:$0xf0] }
 0x102   :  { %1626 = vmatpush.bf16.msra.mxu1 %v2513_v7  ;;  %v3532_v7 = vld [vmem:[#allocation5 + $0x394] sm:$0xf] }
 0x103   :  { %v2865_v16 = vor.u32 %v3532_v7, %v2862_v8  ;;  %v2702_v7 = vld [vmem:[#allocation5 + $0x270] sm:$0xf0]  ;;  %v2708_v8 = vld [vmem:[#allocation5 + $0x258] sm:$0xf] }
 0x104   :  { %v2705_v18 = vor.u32 %v3492_v6, %v2702_v7  ;;  %v2709_v19 = vor.u32 %v3497_v9, %v2708_v8  ;;  %v3585_v6 = vld [vmem:[#allocation5 + $0x534] sm:$0xf0]  ;;  %v3581_v8 = vld [vmem:[#allocation5 + $0x51c] sm:$0xf] }
 0x105   :  { %v3062_v9 = vld [vmem:[#allocation5 + $0x538] sm:$0xf0] }
 0x106   :  { %1627 = vmatpush.bf16.msra.mxu1 %v2481_v20  ;;  %v3524_v20 = vld [vmem:[#allocation5 + $0x354] sm:$0xf] }
 0x107   :  { %v2833_v29 = vor.u32 %v3524_v20, %v2830_v22  ;;  %v2670_v20 = vld [vmem:[#allocation5 + $0x230] sm:$0xf0]  ;;  %v3148_v22 = vld [vmem:[#allocation5 + $0x5d0] sm:$0xf] }
 0x108   :  { %v3149_v32 = vor.u32 %v3608_v11, %v3148_v22  ;;  %v3573_v22 = vld [vmem:[#allocation5 + $0x4dc] sm:$0xf] }
 0x109   :  { %v3030_v11 = vld [vmem:[#allocation5 + $0x4f8] sm:$0xf0] }
 0x10a   :  { %1628 = vmatpush.bf16.msra.mxu1 %v2449_v33  ;;  %v3516_v33 = vld [vmem:[#allocation5 + $0x314] sm:$0xf] }
 0x10b   :  { %v2801_v40 = vor.u32 %v3516_v33, %v2798_v34  ;;  %v3605_v33 = vld [vmem:[#allocation5 + $0x5dc] sm:$0xf] }
 0x10c   :  { %v3158_v34 = vld [vmem:[#allocation5 + $0x5f8] sm:$0xf0] }
 0x10e   :  { %1629 = vmatpush.bf16.msra.mxu1 %v2417_v44  ;;  %v3508_v44 = vld [vmem:[#allocation5 + $0x2d4] sm:$0xf] }
 0x12e   :  { %v212_v45 = vpop.f32.mrf.mxu1 }
 0x12f   :  { %v232_v46 = vrot.slane %v212_v45, 1  ;;  %v235_v47 = vadd.f32 %v3985_v10, %v212_v45  ;;  %v3531_v10 = vld [vmem:[#allocation5 + $0x38c] sm:$0xf]  ;;  %v2766_v45 = vld [vmem:[#allocation5 + $0x2f0] sm:$0xf0] }
 0x130   :  { %v2857_v13 = vor.u32 %v3531_v10, %v2854_v2  ;;  %v2769_v53 = vor.u32 %v3508_v44, %v2766_v45  ;;  %v2694_v10 = vld [vmem:[#allocation5 + $0x268] sm:$0xf0]  ;;  %v3601_v44 = vld [vmem:[#allocation5 + $0x5b4] sm:$0xf0] }
 0x131   :  { %v236_v48 = vadd.f32 %v232_v46, %v3982_v63  ;;  %v237_v54 = vmax.f32 %v235_v47, 0.0  ;;  %v2897_v63 = vor.u32 %v3540_v57, %v2894_v58  ;;  %v2772_v46 = vld [vmem:[#allocation5 + $0x2d8] sm:$0xf]  ;;  %v3500_v57 = vld [vmem:[#allocation5 + $0x294] sm:$0xf] }
 0x132   :  { %v3513_v47 = vld [vmem:[#allocation5 + $0x2f4] sm:$0xf0]  ;;  %v2734_v58 = vld [vmem:[#allocation5 + $0x2b0] sm:$0xf0] }
 0x133   :  { %v238_v49 = vmax.f32 %v236_v48, 0.0  ;;  %v2761_v48 = vor.u32 %v3507_v38, %v2758_v39  ;;  %v2737_v2 = vor.u32 %v3500_v57, %v2734_v58  ;;  %v3593_v57 = vld [vmem:[#allocation5 + $0x574] sm:$0xf0] }
 0x135   :  { %v251_v55 = vrot.slane %v238_v49, 7  ;;  %v2765_v49 = vor.u32 %v3512_v43, %v2764_v42  ;;  %v3118_v42 = vld [vmem:[#allocation5 + $0x5b0] sm:$0xf0]  ;;  %v3124_v43 = vld [vmem:[#allocation5 + $0x598] sm:$0xf] }
 0x137   :  { %v252_v61 = vsel %vm155_vm2, %v251_v55, %v237_v54  ;;  %v2773_v54 = vor.u32 %v3513_v47, %v2772_v46  ;;  %v2732_v55 = vld [vmem:[#allocation5 + $0x290] sm:$0xf]  ;;  %v3597_v46 = vld [vmem:[#allocation5 + $0x59c] sm:$0xf] }
 0x138   :  { %v4007_v0 = vpack.c.bf16 %v252_v61, %v252_v61  ;;  %v2729_v61 = vor.u32 %v3499_v51, %v2726_v52  ;;  %v3126_v47 = vld [vmem:[#allocation5 + $0x5b8] sm:$0xf0]  ;;  %v3125_v52 = vor.u32 %v3601_v44, %v3124_v43  ;;  %v3561_v43 = vld [vmem:[#allocation5 + $0x474] sm:$0xf0] }
 0x13a   :  { %1461 = vmatmul.bf16.vlgmr.msrb.gmra.mxu0 %v4007_v0  ;;  %1500 = vmatmul.bf16.vlgmr.msrb.gmra.mxu3 %v4007_v0 }
 0x13b   :  { %1539 = vmatmul.bf16.vlgmr.msra.gmra.mxu2 %v4007_v0  ;;  %1557 = vmatpush.bf16.msrb.mxu0 %v2889_v62  ;;  %v2733_v62 = vor.u32 %v3504_v56, %v2732_v55  ;;  %v3086_v55 = vld [vmem:[#allocation5 + $0x570] sm:$0xf0]  ;;  %v3092_v56 = vld [vmem:[#allocation5 + $0x558] sm:$0xf] }
 0x13c   :  { %1578 = vmatmul.bf16.vlgmr.msrb.gmra.mxu1 %v4007_v0  ;;  %1596 = vmatpush.bf16.msrb.mxu3 %v2893_v1  ;;  %v3491_v1 = vld [vmem:[#allocation5 + $0x24c] sm:$0xf] }
 0x13d   :  { %1635 = vmatpush.bf16.msra.mxu2 %v2897_v63  ;;  %1674 = vmatpush.bf16.msrb.mxu1 %v2901_v3  ;;  %v2741_v63 = vor.u32 %v3505_v60, %v2740_v59  ;;  %v2700_v3 = vld [vmem:[#allocation5 + $0x250] sm:$0xf]  ;;  %v2697_v12 = vor.u32 %v3491_v1, %v2694_v10  ;;  %v3589_v59 = vld [vmem:[#allocation5 + $0x55c] sm:$0xf]  ;;  %v3093_v10 = vor.u32 %v3593_v57, %v3092_v56  ;;  %v2926_v56 = vld [vmem:[#allocation5 + $0x430] sm:$0xf0] }
 0x13e   :  { %v2701_v14 = vor.u32 %v3496_v4, %v2700_v3  ;;  %v3094_v60 = vld [vmem:[#allocation5 + $0x578] sm:$0xf0]  ;;  %v3054_v3 = vld [vmem:[#allocation5 + $0x530] sm:$0xf0]  ;;  %v3060_v4 = vld [vmem:[#allocation5 + $0x518] sm:$0xf] }
 0x13f   :  { %1558 = vmatpush.bf16.msrb.mxu0 %v2857_v13  ;;  %v3483_v13 = vld [vmem:[#allocation5 + $0x20c] sm:$0xf]  ;;  %v2932_v57 = vld [vmem:[#allocation5 + $0x418] sm:$0xf] }
 0x140   :  { %1597 = vmatpush.bf16.msrb.mxu3 %v2861_v5  ;;  %v2662_v5 = vld [vmem:[#allocation5 + $0x228] sm:$0xf0] }
 0x141   :  { %1636 = vmatpush.bf16.msra.mxu2 %v2865_v16  ;;  %1675 = vmatpush.bf16.msrb.mxu1 %v2869_v17  ;;  %v3488_v16 = vld [vmem:[#allocation5 + $0x22c] sm:$0xf0]  ;;  %v3484_v17 = vld [vmem:[#allocation5 + $0x214] sm:$0xf]  ;;  %v2665_v27 = vor.u32 %v3483_v13, %v2662_v5 }
 0x142   :  { %v2669_v31 = vor.u32 %v3488_v16, %v2668_v15  ;;  %v2673_v35 = vor.u32 %v3484_v17, %v2670_v20  ;;  %v3576_v13 = vld [vmem:[#allocation5 + $0x4ec] sm:$0xf0]  ;;  %v3572_v15 = vld [vmem:[#allocation5 + $0x4d4] sm:$0xf]  ;;  %v3065_v16 = vor.u32 %v3581_v8, %v3062_v9  ;;  %v3469_v8 = vld [vmem:[#allocation5 + $0x19c] sm:$0xf] }
 0x143   :  { %1559 = vmatpush.bf16.msrb.mxu0 %v2825_v25  ;;  %v3489_v25 = vld [vmem:[#allocation5 + $0x234] sm:$0xf0]  ;;  %v3022_v17 = vld [vmem:[#allocation5 + $0x4f0] sm:$0xf0]  ;;  %v2614_v9 = vld [vmem:[#allocation5 + $0x1b8] sm:$0xf0] }
 0x144   :  { %1598 = vmatpush.bf16.msrb.mxu3 %v2829_v26  ;;  %v3604_v26 = vld [vmem:[#allocation5 + $0x5d4] sm:$0xf]  ;;  %v2677_v36 = vor.u32 %v3489_v25, %v2676_v23  ;;  %v2988_v23 = vld [vmem:[#allocation5 + $0x490] sm:$0xf] }
 0x145   :  { %1637 = vmatpush.bf16.msra.mxu2 %v2833_v29  ;;  %1676 = vmatpush.bf16.msrb.mxu1 %v2837_v30  ;;  %v3156_v29 = vld [vmem:[#allocation5 + $0x5d8] sm:$0xf]  ;;  %v3153_v38 = vor.u32 %v3604_v26, %v3150_v28  ;;  %v3568_v25 = vld [vmem:[#allocation5 + $0x4ac] sm:$0xf0]  ;;  %v3025_v26 = vor.u32 %v3572_v15, %v3022_v17  ;;  %v3564_v28 = vld [vmem:[#allocation5 + $0x494] sm:$0xf]  ;;  %v2617_v15 = vor.u32 %v3469_v8, %v2614_v9 }
 0x146   :  { %v3609_v30 = vld [vmem:[#allocation5 + $0x5f4] sm:$0xf0]  ;;  %v2582_v17 = vld [vmem:[#allocation5 + $0x178] sm:$0xf0] }
 0x147   :  { %1560 = vmatpush.bf16.msrb.mxu0 %v2793_v37  ;;  %v3116_v37 = vld [vmem:[#allocation5 + $0x590] sm:$0xf]  ;;  %v3157_v39 = vor.u32 %v3609_v30, %v3156_v29  ;;  %v3033_v29 = vor.u32 %v3573_v22, %v3030_v11  ;;  %v2990_v30 = vld [vmem:[#allocation5 + $0x4b0] sm:$0xf0]  ;;  %v4027_v22 = vpop.f32.mrf.mxu2  ;;  %v3525_v9 = vld [vmem:[#allocation5 + $0x35c] sm:$0xf] }
 0x148   :  { %1599 = vmatpush.bf16.msrb.mxu3 %v2797_v21  ;;  %v3600_v21 = vld [vmem:[#allocation5 + $0x5ac] sm:$0xf0] }
 0x149   :  { %1638 = vmatpush.bf16.msra.mxu2 %v2801_v40  ;;  %1677 = vmatpush.bf16.msrb.mxu1 %v2805_v41  ;;  %v3596_v40 = vld [vmem:[#allocation5 + $0x594] sm:$0xf]  ;;  %v3161_v41 = vor.u32 %v3605_v33, %v3158_v34  ;;  %v3117_v45 = vor.u32 %v3600_v21, %v3116_v37  ;;  %v2989_v33 = vor.u32 %v3568_v25, %v2988_v23  ;;  %v3565_v34 = vld [vmem:[#allocation5 + $0x49c] sm:$0xf]  ;;  %v3560_v37 = vld [vmem:[#allocation5 + $0x46c] sm:$0xf0] }
 0x14a   :  { %1513 = vmatmul.bf16.vlgmr.msra.gmra.mxu0 %v3993_v50  ;;  %1552 = vmatmul.bf16.vlgmr.msra.gmra.mxu3 %v3993_v50  ;;  %v3121_v51 = vor.u32 %v3596_v40, %v3118_v42  ;;  %v2993_v21 = vor.u32 %v3564_v28, %v2990_v30  ;;  %v2964_v42 = vld [vmem:[#allocation5 + $0x458] sm:$0xf]  ;;  %v3453_v23 = vld [vmem:[#allocation5 + $0x11c] sm:$0xf] }
 0x14b   :  { %1561 = vmatpush.bf16.msrb.mxu0 %v2761_v48  ;;  %1591 = vmatmul.bf16.vlgmr.msrb.gmra.mxu2 %v3993_v50  ;;  %v3084_v48 = vld [vmem:[#allocation5 + $0x550] sm:$0xf]  ;;  %v2550_v25 = vld [vmem:[#allocation5 + $0x138] sm:$0xf0]  ;;  %v3449_v28 = vld [vmem:[#allocation5 + $0xf4] sm:$0xf0] }
 0x14c   :  { %1600 = vmatpush.bf16.msrb.mxu3 %v2765_v49  ;;  %1630 = vmatmul.bf16.vlgmr.msra.gmra.mxu1 %v3993_v50  ;;  %v3592_v49 = vld [vmem:[#allocation5 + $0x56c] sm:$0xf0]  ;;  %v3617_v30 = vld [vmem:[#allocation7 + $0x38] sm:$0xff] }
 0x14d   :  { %1639 = vmatpush.bf16.msra.mxu2 %v2769_v53  ;;  %1678 = vmatpush.bf16.msrb.mxu1 %v2773_v54  ;;  %v3588_v53 = vld [vmem:[#allocation5 + $0x554] sm:$0xf]  ;;  %v3129_v54 = vor.u32 %v3597_v46, %v3126_v47  ;;  %v3085_v58 = vor.u32 %v3592_v49, %v3084_v48  ;;  %v2966_v46 = vld [vmem:[#allocation5 + $0x478] sm:$0xf0]  ;;  %v2924_v47 = vld [vmem:[#allocation5 + $0x410] sm:$0xf] }
 0x14e   :  { %v3089_v1 = vor.u32 %v3588_v53, %v3086_v55  ;;  %v3552_v48 = vld [vmem:[#allocation5 + $0x42c] sm:$0xf0]  ;;  %v2644_v53 = vld [vmem:[#allocation5 + $0x1d8] sm:$0xf] }
 0x14f   :  { %1562 = vmatpush.bf16.msrb.mxu0 %v2729_v61  ;;  %v3052_v61 = vld [vmem:[#allocation5 + $0x510] sm:$0xf] }
 0x150   :  { %1601 = vmatpush.bf16.msrb.mxu3 %v2733_v62  ;;  %v3584_v62 = vld [vmem:[#allocation5 + $0x52c] sm:$0xf0] }
 0x151   :  { %1640 = vmatpush.bf16.msra.mxu2 %v2737_v2  ;;  %1679 = vmatpush.bf16.msrb.mxu1 %v2741_v63  ;;  %v3580_v2 = vld [vmem:[#allocation5 + $0x514] sm:$0xf]  ;;  %v3097_v63 = vor.u32 %v3589_v59, %v3094_v60  ;;  %v3053_v7 = vor.u32 %v3584_v62, %v3052_v61  ;;  %v2925_v59 = vor.u32 %v3552_v48, %v2924_v47  ;;  %v3549_v60 = vld [vmem:[#allocation5 + $0x41c] sm:$0xf] }
 0x152   :  { %v3057_v5 = vor.u32 %v3580_v2, %v3054_v3  ;;  %v2934_v61 = vld [vmem:[#allocation5 + $0x438] sm:$0xf0] }
 0x153   :  { %1563 = vmatpush.bf16.msrb.mxu0 %v2697_v12  ;;  %v3020_v12 = vld [vmem:[#allocation5 + $0x4d0] sm:$0xf]  ;;  %v2937_v3 = vor.u32 %v3549_v60, %v2934_v61  ;;  %v2454_v47 = vld [vmem:[#allocation5 + $0x78] sm:$0xf0] }
 0x154   :  { %1602 = vmatpush.bf16.msrb.mxu3 %v2701_v14  ;;  %v3061_v14 = vor.u32 %v3585_v6, %v3060_v4  ;;  %v3021_v20 = vor.u32 %v3576_v13, %v3020_v12  ;;  %v2612_v4 = vld [vmem:[#allocation5 + $0x198] sm:$0xf] }
 0x155   :  { %1641 = vmatpush.bf16.msra.mxu2 %v2705_v18  ;;  %1680 = vmatpush.bf16.msrb.mxu1 %v2709_v19  ;;  %v3028_v18 = vld [vmem:[#allocation5 + $0x4d8] sm:$0xf] }
 0x156   :  { %v3577_v19 = vld [vmem:[#allocation5 + $0x4f4] sm:$0xf0] }
 0x157   :  { %1564 = vmatpush.bf16.msrb.mxu0 %v2665_v27  ;;  %v3029_v27 = vor.u32 %v3577_v19, %v3028_v18  ;;  %v3473_v6 = vld [vmem:[#allocation5 + $0x1b4] sm:$0xf0] }
 0x158   :  { %1603 = vmatpush.bf16.msrb.mxu3 %v2669_v31  ;;  %v2996_v31 = vld [vmem:[#allocation5 + $0x498] sm:$0xf]  ;;  %v2613_v12 = vor.u32 %v3473_v6, %v2612_v4  ;;  %v3612_v4 = vld [vmem:[#allocation7 + $0x10] sm:$0xff] }
 0x159   :  { %1642 = vmatpush.bf16.msra.mxu2 %v2673_v35  ;;  %1681 = vmatpush.bf16.msrb.mxu1 %v2677_v36  ;;  %v2998_v35 = vld [vmem:[#allocation5 + $0x4b8] sm:$0xf0]  ;;  %v2956_v36 = vld [vmem:[#allocation5 + $0x450] sm:$0xf]  ;;  %v2580_v13 = vld [vmem:[#allocation5 + $0x158] sm:$0xf] }
 0x15a   :  { %1565 = vmatmul.bf16.vlgmr.msrb.gmra.mxu0 %v3999_v24  ;;  %v3001_v40 = vor.u32 %v3565_v34, %v2998_v35  ;;  %v2957_v44 = vor.u32 %v3560_v37, %v2956_v36  ;;  %v2548_v19 = vld [vmem:[#allocation5 + $0x118] sm:$0xf]  ;;  %v3616_v36 = vld [vmem:[#allocation7 + $0x30] sm:$0xff]  ;;  %v1438_v37 = vpop.f32.mrf.mxu2 }
 0x15b   :  { %1609 = vmatpush.bf16.msra.mxu0 %v3149_v32  ;;  %1604 = vmatmul.bf16.vlgmr.msrb.gmra.mxu3 %v3999_v24  ;;  %v3569_v32 = vld [vmem:[#allocation5 + $0x4b4] sm:$0xf0]  ;;  %v4040_v37 = vld [vmem:[%s4078_s7] sm:$0xff] }
 0x15c   :  { %1648 = vmatpush.bf16.msra.mxu3 %v3153_v38  ;;  %1643 = vmatmul.bf16.vlgmr.msra.gmra.mxu2 %v3999_v24  ;;  %v2997_v38 = vor.u32 %v3569_v32, %v2996_v31  ;;  %v2553_v31 = vor.u32 %v3453_v23, %v2550_v25  ;;  %v3445_v32 = vld [vmem:[#allocation5 + $0xdc] sm:$0xf]  ;;  %v2484_v34 = vld [vmem:[#allocation5 + $0x98] sm:$0xf]  ;;  %v3610_v23 = vld [vmem:[#allocation7] sm:$0xff] }
 0x15d   :  { %1687 = vmatpush.bf16.msrb.mxu2 %v3157_v39  ;;  %1726 = vmatpush.bf16.msra.mxu1 %v3161_v41  ;;  %v3556_v39 = vld [vmem:[#allocation5 + $0x454] sm:$0xf]  ;;  %v3441_v35 = vld [vmem:[#allocation5 + $0xb4] sm:$0xf0]  ;;  %v3622_v25 = vld [vmem:[#allocation7 + $0x60] sm:$0xff] }
 0x15e   :  { %1682 = vmatmul.bf16.vlgmr.msrb.gmra.mxu1 %v3999_v24  ;;  %v2958_v41 = vld [vmem:[#allocation5 + $0x470] sm:$0xf0] }
 0x15f   :  { %1610 = vmatpush.bf16.msra.mxu0 %v3117_v45  ;;  %v3557_v45 = vld [vmem:[#allocation5 + $0x45c] sm:$0xf]  ;;  %v2961_v49 = vor.u32 %v3556_v39, %v2958_v41  ;;  %v2452_v41 = vld [vmem:[#allocation5 + $0x58] sm:$0xf] }
 0x160   :  { %1649 = vmatpush.bf16.msra.mxu3 %v3121_v51  ;;  %v2965_v51 = vor.u32 %v3561_v43, %v2964_v42  ;;  %v2969_v55 = vor.u32 %v3557_v45, %v2966_v46  ;;  %v2486_v39 = vld [vmem:[#allocation5 + $0xb8] sm:$0xf0]  ;;  %v3433_v42 = vld [vmem:[#allocation5 + $0x74] sm:$0xf0] }
 0x161   :  { %1688 = vmatpush.bf16.msrb.mxu2 %v3125_v52  ;;  %1727 = vmatpush.bf16.msra.mxu1 %v3129_v54  ;;  %v3548_v52 = vld [vmem:[#allocation5 + $0x414] sm:$0xf]  ;;  %v3481_v54 = vld [vmem:[#allocation5 + $0x1f4] sm:$0xf0]  ;;  %v3429_v46 = vld [vmem:[#allocation5 + $0x5c] sm:$0xf]  ;;  %v2453_v48 = vor.u32 %v3433_v42, %v2452_v41 }
 0x162   :  { %v2645_v62 = vor.u32 %v3481_v54, %v2644_v53  ;;  %v2929_v2 = vor.u32 %v3548_v52, %v2926_v56  ;;  %v3614_v52 = vld [vmem:[#allocation7 + $0x20] sm:$0xff]  ;;  %v4031_v53 = vpop.f32.mrf.mxu3  ;;  %v4033_v54 = vpop.f32.mrf.mxu2  ;;  %v2902_v56 = vld [vmem:[#allocation5 + $0x3f8] sm:$0xf0] }
 0x163   :  { %1611 = vmatpush.bf16.msra.mxu0 %v3085_v58  ;;  %v3553_v58 = vld [vmem:[#allocation5 + $0x434] sm:$0xf0]  ;;  %v3618_v42 = vld [vmem:[#allocation7 + $0x40] sm:$0xff] }
 0x164   :  { %1650 = vmatpush.bf16.msra.mxu3 %v3089_v1  ;;  %v3477_v1 = vld [vmem:[#allocation5 + $0x1dc] sm:$0xf] }
 0x165   :  { %1689 = vmatpush.bf16.msrb.mxu2 %v3093_v10  ;;  %1728 = vmatpush.bf16.msra.mxu1 %v3097_v63  ;;  %v2646_v10 = vld [vmem:[#allocation5 + $0x1f8] sm:$0xf0]  ;;  %v2933_v63 = vor.u32 %v3553_v58, %v2932_v57  ;;  %v2457_v57 = vor.u32 %v3429_v46, %v2454_v47  ;;  %v3632_v46 = vld [vmem:[#allocation7 + $0xb0] sm:$0xff] }
 0x166   :  { %v3421_v58 = vld [vmem:[#allocation5 + $0x1c] sm:$0xf] }
 0x167   :  { %1612 = vmatpush.bf16.msra.mxu0 %v3053_v7  ;;  %v2649_v7 = vor.u32 %v3477_v1, %v2646_v10  ;;  %v3613_v1 = vld [vmem:[#allocation7 + $0x18] sm:$0xff] }
 0x168   :  { %1651 = vmatpush.bf16.msra.mxu3 %v3057_v5  ;;  %v3465_v5 = vld [vmem:[#allocation5 + $0x174] sm:$0xf0]  ;;  %v3533_v10 = vld [vmem:[#allocation5 + $0x39c] sm:$0xf] }
 0x169   :  { %1690 = vmatpush.bf16.msrb.mxu2 %v3061_v14  ;;  %1729 = vmatpush.bf16.msra.mxu1 %v3065_v16  ;;  %v4022_v14 = vpop.f32.mrf.mxu1  ;;  %v3461_v16 = vld [vmem:[#allocation5 + $0x15c] sm:$0xf]  ;;  %v2581_v18 = vor.u32 %v3465_v5, %v2580_v13  ;;  %v3624_v13 = vld [vmem:[#allocation7 + $0x70] sm:$0xff] }
 0x16a   :  { %v2585_v11 = vor.u32 %v3461_v16, %v2582_v17  ;;  %v1490_v8 = vpop.f32.mrf.mxu2  ;;  %v2806_v16 = vld [vmem:[#allocation5 + $0x338] sm:$0xf0]  ;;  %v3623_v17 = vld [vmem:[#allocation7 + $0x68] sm:$0xff] }
 0x16b   :  { %1613 = vmatpush.bf16.msra.mxu0 %v3021_v20  ;;  %v3457_v20 = vld [vmem:[#allocation5 + $0x134] sm:$0xf0] }
 0x16c   :  { %1652 = vmatpush.bf16.msra.mxu3 %v3025_v26  ;;  %v2549_v26 = vor.u32 %v3457_v20, %v2548_v19  ;;  %v3509_v20 = vld [vmem:[#allocation5 + $0x2dc] sm:$0xf] }
 0x16d   :  { %1691 = vmatpush.bf16.msrb.mxu2 %v3029_v27  ;;  %1730 = vmatpush.bf16.msra.mxu1 %v3033_v29  ;;  %v2516_v27 = vld [vmem:[#allocation5 + $0xd8] sm:$0xf] }
 0x16e   :  { %v3633_v41 = vld [vmem:[#allocation7 + $0xb8] sm:$0xff] }
 0x16f   :  { %1614 = vmatpush.bf16.msra.mxu0 %v2989_v33  ;;  %v2517_v33 = vor.u32 %v3449_v28, %v2516_v27  ;;  %v3501_v27 = vld [vmem:[#allocation5 + $0x29c] sm:$0xf] }
 0x170   :  { %1653 = vmatpush.bf16.msra.mxu3 %v2993_v21  ;;  %v2742_v28 = vld [vmem:[#allocation5 + $0x2b8] sm:$0xf0] }
 0x171   :  { %1692 = vmatpush.bf16.msrb.mxu2 %v2997_v38  ;;  %1731 = vmatpush.bf16.msra.mxu1 %v3001_v40  ;;  %v1477_v29 = vpop.f32.mrf.mxu1  ;;  %v3437_v38 = vld [vmem:[#allocation5 + $0x9c] sm:$0xf]  ;;  %v2485_v40 = vor.u32 %v3441_v35, %v2484_v34 }
 0x172   :  { %v2489_v45 = vor.u32 %v3437_v38, %v2486_v39  ;;  %v3641_v29 = vld [vmem:[#allocation7 + $0xf8] sm:$0xff]  ;;  %v3639_v39 = vld [vmem:[#allocation7 + $0xe8] sm:$0xff] }
 0x173   :  { %1615 = vmatpush.bf16.msra.mxu0 %v2957_v44  ;;  %v3615_v44 = vld [vmem:[#allocation7 + $0x28] sm:$0xff]  ;;  %v3485_v35 = vld [vmem:[#allocation5 + $0x21c] sm:$0xf] }
 0x174   :  { %1654 = vmatpush.bf16.msra.mxu3 %v2961_v49  ;;  %v2420_v49 = vld [vmem:[#allocation5 + $0x18] sm:$0xf] }
 0x175   :  { %1693 = vmatpush.bf16.msrb.mxu2 %v2965_v51  ;;  %1732 = vmatpush.bf16.msra.mxu1 %v2969_v55  ;;  %v3425_v51 = vld [vmem:[#allocation5 + $0x34] sm:$0xf0]  ;;  %v3541_v55 = vld [vmem:[#allocation5 + $0x3dc] sm:$0xf] }
 0x176   :  { %v2421_v60 = vor.u32 %v3425_v51, %v2420_v49  ;;  %v2905_v61 = vor.u32 %v3541_v55, %v2902_v56  ;;  %v3637_v47 = vld [vmem:[#allocation7 + $0xd8] sm:$0xff]  ;;  %v3631_v51 = vld [vmem:[#allocation7 + $0xa8] sm:$0xff] }
 0x177   :  { %1616 = vmatpush.bf16.msra.mxu0 %v2925_v59  ;;  %v2422_v59 = vld [vmem:[#allocation5 + $0x38] sm:$0xf0] }
 0x178   :  { %1655 = vmatpush.bf16.msra.mxu3 %v2929_v2  ;;  %v2870_v2 = vld [vmem:[#allocation5 + $0x3b8] sm:$0xf0] }
 0x179   :  { %1694 = vmatpush.bf16.msrb.mxu2 %v2933_v63  ;;  %1733 = vmatpush.bf16.msra.mxu1 %v2937_v3  ;;  %v4029_v43 = vpop.f32.mrf.mxu1  ;;  %v2425_v63 = vor.u32 %v3421_v58, %v2422_v59  ;;  %v3625_v3 = vld [vmem:[#allocation7 + $0x78] sm:$0xff]  ;;  %v2873_v6 = vor.u32 %v3533_v10, %v2870_v2 }
 0x17a   :  { %1617 = vmatmul.bf16.vlgmr.msra.gmra.mxu0 %v4007_v0 }
 0x17b   :  { %1661 = vmatpush.bf16.msrb.mxu0 %v2645_v62  ;;  %1656 = vmatmul.bf16.vlgmr.msra.gmra.mxu3 %v4007_v0 }
 0x17c   :  { %1700 = vmatpush.bf16.msrb.mxu3 %v2649_v7  ;;  %1695 = vmatmul.bf16.vlgmr.msrb.gmra.mxu2 %v4007_v0  ;;  %v1451_v7 = vpop.f32.mrf.mxu3 }
 0x17d   :  { %1734 = vmatmul.bf16.vlgmr.msra.gmra.mxu1 %v4007_v0  ;;  %v2518_v0 = vld [vmem:[#allocation5 + $0xf8] sm:$0xf0]  ;;  %2271 = vmatpush.bf16.msra.mxu2 %v3617_v30  ;;  %v2745_v30 = vor.u32 %v3501_v27, %v2742_v28  ;;  %v3654_v27 = vld [vmem:[#allocation7 + $0x160] sm:$0xff] }
 0x17e   :  { %v2521_v21 = vor.u32 %v3445_v32, %v2518_v0  ;;  %v2710_v32 = vld [vmem:[#allocation5 + $0x278] sm:$0xf0]  ;;  %2310 = vmatpush.bf16.msrb.mxu1 %v3641_v29  ;;  %v3620_v0 = vld [vmem:[#allocation7 + $0x50] sm:$0xff] }
 0x17f   :  { %1662 = vmatpush.bf16.msrb.mxu0 %v2613_v12  ;;  %v2838_v12 = vld [vmem:[#allocation5 + $0x378] sm:$0xf0] }
 0x180   :  { %1701 = vmatpush.bf16.msrb.mxu3 %v2617_v15  ;;  %v2841_v5 = vor.u32 %v3525_v9, %v2838_v12  ;;  %v3517_v15 = vld [vmem:[#allocation5 + $0x31c] sm:$0xf]  ;;  %v3647_v9 = vld [vmem:[#allocation7 + $0x128] sm:$0xff]  ;;  %v3656_v12 = vld [vmem:[#allocation7 + $0x170] sm:$0xff] }
 0x181   :  { %2272 = vmatpush.bf16.msra.mxu2 %v3616_v36  ;;  %v1529_v62 = vpop.f32.mrf.mxu1  ;;  %v2809_v19 = vor.u32 %v3517_v15, %v2806_v16  ;;  %v2678_v36 = vld [vmem:[#allocation5 + $0x238] sm:$0xf0] }
 0x182   :  { %v2681_v38 = vor.u32 %v3485_v35, %v2678_v36 }
 0x183   :  { %1663 = vmatpush.bf16.msrb.mxu0 %v2581_v18  ;;  %v3611_v18 = vld [vmem:[#allocation7 + $0x8] sm:$0xff] }
 0x184   :  { %1702 = vmatpush.bf16.msrb.mxu3 %v2585_v11  ;;  %v2774_v11 = vld [vmem:[#allocation5 + $0x2f8] sm:$0xf0] }
 0x185   :  { %2273 = vmatpush.bf16.msra.mxu2 %v3615_v44  ;;  %v3638_v44 = vld [vmem:[#allocation7 + $0xe0] sm:$0xff] }
 0x187   :  { %1664 = vmatpush.bf16.msrb.mxu0 %v2549_v26  ;;  %v2777_v26 = vor.u32 %v3509_v20, %v2774_v11  ;;  %v3626_v11 = vld [vmem:[#allocation7 + $0x80] sm:$0xff] }
 0x188   :  { %1703 = vmatpush.bf16.msrb.mxu3 %v2553_v31  ;;  %v3493_v31 = vld [vmem:[#allocation5 + $0x25c] sm:$0xf] }
 0x189   :  { %2274 = vmatpush.bf16.msra.mxu2 %v3614_v52  ;;  %v2713_v34 = vor.u32 %v3493_v31, %v2710_v32  ;;  %v3636_v52 = vld [vmem:[#allocation7 + $0xd0] sm:$0xff] }
 0x18a   :  { %v3644_v32 = vld [vmem:[#allocation7 + $0x110] sm:$0xff] }
 0x18b   :  { %1665 = vmatpush.bf16.msrb.mxu0 %v2517_v33  ;;  %v3640_v33 = vld [vmem:[#allocation7 + $0xf0] sm:$0xff] }
 0x18c   :  { %1704 = vmatpush.bf16.msrb.mxu3 %v2521_v21  ;;  %2311 = vmatpush.bf16.msrb.mxu1 %v3640_v33  ;;  %v3619_v21 = vld [vmem:[#allocation7 + $0x48] sm:$0xff] }
 0x18d   :  { %2275 = vmatpush.bf16.msra.mxu2 %v3613_v1  ;;  %v3649_v1 = vld [vmem:[#allocation7 + $0x138] sm:$0xff] }
 0x18f   :  { %1666 = vmatpush.bf16.msrb.mxu0 %v2485_v40  ;;  %v451_v40 = vperm.slane %v4040_v37, 0 }
 0x190   :  { %1705 = vmatpush.bf16.msrb.mxu3 %v2489_v45  ;;  %2312 = vmatpush.bf16.msrb.mxu1 %v3639_v39  ;;  %v3652_v39 = vld [vmem:[#allocation7 + $0x150] sm:$0xff] }
 0x191   :  { %2276 = vmatpush.bf16.msra.mxu2 %v3612_v4  ;;  %v1437_v45 = vadd.f32 %v4027_v22, %v451_v40  ;;  %v3630_v22 = vld [vmem:[#allocation7 + $0xa0] sm:$0xff] }
 0x193   :  { %1667 = vmatpush.bf16.msrb.mxu0 %v2453_v48  ;;  %v452_v48 = vperm.slane %v4040_v37, 1  ;;  %v1450_v49 = vadd.f32 %v4031_v53, %v1437_v45  ;;  %v3629_v53 = vld [vmem:[#allocation7 + $0x98] sm:$0xff] }
 0x194   :  { %1706 = vmatpush.bf16.msrb.mxu3 %v2457_v57  ;;  %2313 = vmatpush.bf16.msrb.mxu1 %v3638_v44 }
 0x195   :  { %2277 = vmatpush.bf16.msra.mxu2 %v3611_v18  ;;  %v1476_v55 = vadd.f32 %v4022_v14, %v452_v48  ;;  %v3646_v18 = vld [vmem:[#allocation7 + $0x120] sm:$0xff]  ;;  %v3665_v48 = vld [vmem:[#allocation7 + $0x1b8] sm:$0xff] }
 0x197   :  { %1668 = vmatpush.bf16.msrb.mxu0 %v2421_v60  ;;  %v1489_v59 = vadd.f32 %v4033_v54, %v1476_v55  ;;  %v3657_v54 = vld [vmem:[#allocation7 + $0x178] sm:$0xff] }
 0x198   :  { %1707 = vmatpush.bf16.msrb.mxu3 %v2425_v63  ;;  %2314 = vmatpush.bf16.msrb.mxu1 %v3637_v47  ;;  %v3634_v63 = vld [vmem:[#allocation7 + $0xc0] sm:$0xff] }
 0x199   :  { %2278 = vmatpush.bf16.msra.mxu2 %v3610_v23 }
 0x19a   :  { %1669 = vmatmul.bf16.vlgmr.msrb.gmra.mxu0 %v3993_v50 }
 0x19b   :  { %1713 = vmatpush.bf16.msra.mxu0 %v2905_v61  ;;  %1708 = vmatmul.bf16.vlgmr.msrb.gmra.mxu3 %v3993_v50  ;;  %v3621_v50 = vld [vmem:[#allocation7 + $0x58] sm:$0xff]  ;;  %v3635_v61 = vld [vmem:[#allocation7 + $0xc8] sm:$0xff] }
 0x19c   :  { %2284 = vmatpush.bf16.msra.mxu3 %v3625_v3  ;;  %2315 = vmatpush.bf16.msrb.mxu1 %v3636_v52  ;;  %v3648_v3 = vld [vmem:[#allocation7 + $0x130] sm:$0xff]  ;;  %v3650_v52 = vld [vmem:[#allocation7 + $0x140] sm:$0xff] }
 0x19d   :  { %2323 = vmatpush.bf16.msrb.mxu2 %v3649_v1  ;;  %v456_v1 = vperm.slane %v4040_v37, 5 }
 0x19f   :  { %1714 = vmatpush.bf16.msra.mxu0 %v2873_v6  ;;  %v3628_v6 = vld [vmem:[#allocation7 + $0x90] sm:$0xff] }
 0x1a0   :  { %2285 = vmatpush.bf16.msra.mxu3 %v3624_v13  ;;  %2316 = vmatpush.bf16.msrb.mxu1 %v3635_v61  ;;  %v453_v13 = vperm.slane %v4040_v37, 2 }
 0x1a1   :  { %2324 = vmatpush.bf16.msrb.mxu2 %v3648_v3 }
 0x1a3   :  { %1715 = vmatpush.bf16.msra.mxu0 %v2841_v5  ;;  %v3627_v5 = vld [vmem:[#allocation7 + $0x88] sm:$0xff] }
 0x1a4   :  { %2286 = vmatpush.bf16.msra.mxu3 %v3623_v17  ;;  %2317 = vmatpush.bf16.msrb.mxu1 %v3634_v63 }
 0x1a5   :  { %2325 = vmatpush.bf16.msrb.mxu2 %v3647_v9  ;;  %v3673_v9 = vld [vmem:[#allocation7 + $0x1f8] sm:$0xff] }
 0x1a7   :  { %1716 = vmatpush.bf16.msra.mxu0 %v2809_v19  ;;  %v3655_v19 = vld [vmem:[#allocation7 + $0x168] sm:$0xff] }
 0x1a8   :  { %2287 = vmatpush.bf16.msra.mxu3 %v3622_v25  ;;  %2362 = vmatpush.bf16.msra.mxu1 %v3673_v9 }
 0x1a9   :  { %2326 = vmatpush.bf16.msrb.mxu2 %v3646_v18 }
 0x1ab   :  { %1717 = vmatpush.bf16.msra.mxu0 %v2777_v26  ;;  %v3645_v26 = vld [vmem:[#allocation7 + $0x118] sm:$0xff] }
 0x1ac   :  { %2288 = vmatpush.bf16.msra.mxu3 %v3621_v50 }
 0x1ad   :  { %2327 = vmatpush.bf16.msrb.mxu2 %v3645_v26 }
 0x1af   :  { %1718 = vmatpush.bf16.msra.mxu0 %v2745_v30 }
 0x1b0   :  { %2289 = vmatpush.bf16.msra.mxu3 %v3620_v0  ;;  %v3653_v0 = vld [vmem:[#allocation7 + $0x158] sm:$0xff] }
 0x1b1   :  { %2328 = vmatpush.bf16.msrb.mxu2 %v3644_v32 }
 0x1b3   :  { %1719 = vmatpush.bf16.msra.mxu0 %v2713_v34  ;;  %v454_v34 = vperm.slane %v4040_v37, 3 }
 0x1b4   :  { %2290 = vmatpush.bf16.msra.mxu3 %v3619_v21  ;;  %v3643_v21 = vld [vmem:[#allocation7 + $0x108] sm:$0xff] }
 0x1b5   :  { %2329 = vmatpush.bf16.msrb.mxu2 %v3643_v21 }
 0x1b7   :  { %1720 = vmatpush.bf16.msra.mxu0 %v2681_v38  ;;  %v1462_v56 = vpop.f32.mrf.mxu0 }
 0x1b8   :  { %2291 = vmatpush.bf16.msra.mxu3 %v3618_v42  ;;  %v1463_v57 = vadd.f32 %v1462_v56, %v1450_v49  ;;  %v3642_v42 = vld [vmem:[#allocation7 + $0x100] sm:$0xff] }
 0x1b9   :  { %v4048_v58 = vpop.f32.mrf.mxu1  ;;  %2330 = vmatpush.bf16.msrb.mxu2 %v3642_v42 }
 0x1ba   :  { %1721 = vmatmul.bf16.vlgmr.msra.gmra.mxu0 %v3999_v24  ;;  %v1739_v60 = vmax.f32 %v1463_v57, 0.0 }
 0x1bb   :  { %2297 = vmatpush.bf16.msrb.mxu0 %v3633_v41 }
 0x1bc   :  { %v1747_v24 = vpack.c.bf16 %v1739_v60, %v1739_v60  ;;  %2336 = vmatpush.bf16.msrb.mxu3 %v3657_v54 }
 0x1bd   :  { %v1501_v62 = vpop.f32.mrf.mxu3 }
 0x1be   :  { %v1502_v10 = vadd.f32 %v1501_v62, %v1489_v59  ;;  %v1540_v2 = vpop.f32.mrf.mxu2  ;;  %2279 = vmatmul.bf16.vlgmr.msra.gmra.mxu2 %v1747_v24  ;;  %v3663_v59 = vld [vmem:[#allocation7 + $0x1a8] sm:$0xff]  ;;  %v455_v24 = vperm.slane %v4040_v37, 4 }
 0x1bf   :  { %2298 = vmatpush.bf16.msrb.mxu0 %v3632_v46  ;;  %v1464_v14 = vpop.f32.mrf.mxu0  ;;  %v3651_v46 = vld [vmem:[#allocation7 + $0x148] sm:$0xff] }
 0x1c0   :  { %v1740_v4 = vmax.f32 %v1502_v10, 0.0  ;;  %2337 = vmatpush.bf16.msrb.mxu3 %v3656_v12  ;;  %v3658_v12 = vld [vmem:[#allocation7 + $0x180] sm:$0xff] }
 0x1c1   :  { %v1581_v7 = vpop.f32.mrf.mxu1 }
 0x1c2   :  { %v1748_v8 = vpack.c.bf16 %v1740_v4, %v1740_v4  ;;  %v3659_v4 = vld [vmem:[#allocation7 + $0x188] sm:$0xff] }
 0x1c3   :  { %2299 = vmatpush.bf16.msrb.mxu0 %v3631_v51 }
 0x1c4   :  { %2292 = vmatmul.bf16.vlgmr.msra.gmra.mxu3 %v1748_v8 }
 0x1c5   :  { %v1503_v15 = vpop.f32.mrf.mxu3  ;;  %2338 = vmatpush.bf16.msrb.mxu3 %v3655_v19 }
 0x1c6   :  { %v1542_v16 = vpop.f32.mrf.mxu2 }
 0x1c7   :  { %2300 = vmatpush.bf16.msrb.mxu0 %v3630_v22  ;;  %v1514_v17 = vpop.f32.mrf.mxu0  ;;  %v3664_v22 = vld [vmem:[#allocation7 + $0x1b0] sm:$0xff] }
 0x1c8   :  { %v1515_v20 = vadd.f32 %v1514_v17, %v453_v13  ;;  %v3672_v17 = vld [vmem:[#allocation7 + $0x1f0] sm:$0xff] }
 0x1c9   :  { %v4052_v23 = vpop.f32.mrf.mxu1  ;;  %2339 = vmatpush.bf16.msrb.mxu3 %v3654_v27  ;;  %2363 = vmatpush.bf16.msra.mxu1 %v3672_v17  ;;  %v3669_v27 = vld [vmem:[#allocation7 + $0x1d8] sm:$0xff] }
 0x1ca   :  { %v1528_v25 = vadd.f32 %v4029_v43, %v1515_v20  ;;  %v1632_v63 = vadd.f32 %v4052_v23, %v456_v1  ;;  %v3671_v20 = vld [vmem:[#allocation7 + $0x1e8] sm:$0xff]  ;;  %v3670_v23 = vld [vmem:[#allocation7 + $0x1e0] sm:$0xff] }
 0x1cb   :  { %2301 = vmatpush.bf16.msrb.mxu0 %v3629_v53  ;;  %v3661_v53 = vld [vmem:[#allocation7 + $0x198] sm:$0xff] }
 0x1cc   :  { %v1541_v28 = vadd.f32 %v1540_v2, %v1528_v25  ;;  %v3660_v2 = vld [vmem:[#allocation7 + $0x190] sm:$0xff] }
 0x1cd   :  { %v1553_v50 = vpop.f32.mrf.mxu3  ;;  %2340 = vmatpush.bf16.msrb.mxu3 %v3653_v0  ;;  %2364 = vmatpush.bf16.msra.mxu1 %v3671_v20  ;;  %v3666_v0 = vld [vmem:[#allocation7 + $0x1c0] sm:$0xff] }
 0x1ce   :  { %v1741_v29 = vmax.f32 %v1541_v28, 0.0  ;;  %v1592_v30 = vpop.f32.mrf.mxu2  ;;  %v1554_v43 = vadd.f32 %v1553_v50, %v454_v34  ;;  %v3668_v28 = vld [vmem:[#allocation7 + $0x1d0] sm:$0xff]  ;;  %v457_v50 = vperm.slane %v4040_v37, 6 }
 0x1cf   :  { %2302 = vmatpush.bf16.msrb.mxu0 %v3628_v6  ;;  %v1516_v31 = vpop.f32.mrf.mxu0  ;;  %v1593_v62 = vadd.f32 %v1592_v30, %v455_v24 }
 0x1d0   :  { %v1749_v33 = vpack.c.bf16 %v1741_v29, %v1741_v29  ;;  %v3667_v29 = vld [vmem:[#allocation7 + $0x1c8] sm:$0xff] }
 0x1d1   :  { %v1633_v35 = vpop.f32.mrf.mxu1  ;;  %2341 = vmatpush.bf16.msrb.mxu3 %v3652_v39  ;;  %2365 = vmatpush.bf16.msra.mxu1 %v3670_v23 }
 0x1d3   :  { %2303 = vmatpush.bf16.msrb.mxu0 %v3627_v5 }
 0x1d5   :  { %v1555_v36 = vpop.f32.mrf.mxu3  ;;  %2342 = vmatpush.bf16.msrb.mxu3 %v3651_v46  ;;  %2366 = vmatpush.bf16.msra.mxu1 %v3669_v27 }
 0x1d6   :  { %v1594_v38 = vpop.f32.mrf.mxu2 }
 0x1d7   :  { %2304 = vmatpush.bf16.msrb.mxu0 %v3626_v11  ;;  %v1566_v40 = vpop.f32.mrf.mxu0  ;;  %v458_v38 = vperm.slane %v4040_v37, 7 }
 0x1d8   :  { %v1567_v41 = vadd.f32 %v1566_v40, %v1554_v43 }
 0x1d9   :  { %2343 = vmatpush.bf16.msrb.mxu3 %v3650_v52  ;;  %2367 = vmatpush.bf16.msra.mxu1 %v3668_v28 }
 0x1da   :  { %2305 = vmatmul.bf16.vlgmr.msrb.gmra.mxu0 %v1749_v33  ;;  %v1580_v45 = vadd.f32 %v4048_v58, %v1567_v41  ;;  %v3662_v58 = vld [vmem:[#allocation7 + $0x1a0] sm:$0xff] }
 0x1db   :  { %v4056_v44 = vpop.f32.mrf.mxu1  ;;  %2349 = vmatpush.bf16.msra.mxu0 %v3665_v48  ;;  %v3688_v48 = vld [vmem:[%s4080_s9] ss:$0 sm:$0xff]  ;;  %s3803_s9 = smov [#allocation8]  }
 0x1dc   :  { %v1742_v47 = vmax.f32 %v1580_v45, 0.0  ;;  %s2381_s21 = sshll.u32 %s3803_s9, 4  ;;  %s2382_s21 = int_to_ptr.vmem [resolvable:$true] %s2381_s21 }
 0x1dd   :  { %2368 = vmatpush.bf16.msra.mxu1 %v3667_v29 }
 0x1de   :  { %v1750_v49 = vpack.c.bf16 %v1742_v47, %v1742_v47  ;;  %v1605_v51 = vpop.f32.mrf.mxu3 }
 0x1df   :  { %v1644_v55 = vpop.f32.mrf.mxu2  ;;  %v1568_v56 = vpop.f32.mrf.mxu0  ;;  %2350 = vmatpush.bf16.msra.mxu0 %v3664_v22  ;;  %v1606_v10 = vadd.f32 %v1605_v51, %v1593_v62 }
 0x1e0   :  { %2318 = vmatmul.bf16.vlgmr.msrb.gmra.mxu1 %v1750_v49  ;;  %v1645_v54 = vadd.f32 %v1644_v55, %v1632_v63 }
 0x1e1   :  { %2369 = vmatpush.bf16.msra.mxu1 %v3666_v0 }
 0x1e3   :  { %v1685_v57 = vpop.f32.mrf.mxu1  ;;  %2351 = vmatpush.bf16.msra.mxu0 %v3663_v59 }
 0x1e6   :  { %v1607_v60 = vpop.f32.mrf.mxu3 }
 0x1e7   :  { %v1646_v61 = vpop.f32.mrf.mxu2  ;;  %2352 = vmatpush.bf16.msra.mxu0 %v3662_v58 }
 0x1eb   :  { %2353 = vmatpush.bf16.msra.mxu0 %v3661_v53 }
 0x1ef   :  { %2354 = vmatpush.bf16.msra.mxu0 %v3660_v2 }
 0x1f3   :  { %2355 = vmatpush.bf16.msra.mxu0 %v3659_v4 }
 0x1f7   :  { %v1618_v14 = vpop.f32.mrf.mxu0  ;;  %2356 = vmatpush.bf16.msra.mxu0 %v3658_v12 }
 0x1f8   :  { %v1619_v3 = vadd.f32 %v1618_v14, %v1606_v10 }
 0x1fa   :  { %v1743_v6 = vmax.f32 %v1619_v3, 0.0  ;;  %v1735_v7 = vpop.f32.mrf.mxu1 }
 0x1fc   :  { %v1751_v8 = vpack.c.bf16 %v1743_v6, %v1743_v6 }
 0x1fe   :  { %2331 = vmatmul.bf16.vlgmr.msrb.gmra.mxu2 %v1751_v8  ;;  %v1657_v13 = vpop.f32.mrf.mxu3 }
 0x1ff   :  { %v1696_v5 = vpop.f32.mrf.mxu2  ;;  %v1658_v15 = vadd.f32 %v1657_v13, %v1645_v54  ;;  %v1620_v16 = vpop.f32.mrf.mxu0 }
 0x201   :  { %v1744_v18 = vmax.f32 %v1658_v15, 0.0 }
 0x202   :  { %v1737_v19 = vpop.f32.mrf.mxu1 }
 0x203   :  { %v1752_v11 = vpack.c.bf16 %v1744_v18, %v1744_v18 }
 0x205   :  { %2344 = vmatmul.bf16.vlgmr.msrb.gmra.mxu3 %v1752_v11 }
 0x206   :  { %v1659_v25 = vpop.f32.mrf.mxu3 }
 0x207   :  { %v1698_v26 = vpop.f32.mrf.mxu2 }
 0x217   :  { %v1670_v30 = vpop.f32.mrf.mxu0 }
 0x218   :  { %v1671_v31 = vadd.f32 %v1670_v30, %v457_v50 }
 0x21a   :  { %v1684_v32 = vadd.f32 %v4056_v44, %v1671_v31 }
 0x21c   :  { %v1697_v33 = vadd.f32 %v1696_v5, %v1684_v32 }
 0x21e   :  { %v1745_v34 = vmax.f32 %v1697_v33, 0.0  ;;  %v1709_v43 = vpop.f32.mrf.mxu3 }
 0x21f   :  { %v1672_v35 = vpop.f32.mrf.mxu0  ;;  %v1710_v39 = vadd.f32 %v1709_v43, %v458_v38 }
 0x220   :  { %v1753_v36 = vpack.c.bf16 %v1745_v34, %v1745_v34 }
 0x222   :  { %2357 = vmatmul.bf16.vlgmr.msra.gmra.mxu0 %v1753_v36 }
 0x226   :  { %v1711_v21 = vpop.f32.mrf.mxu3 }
 0x237   :  { %v1722_v40 = vpop.f32.mrf.mxu0 }
 0x238   :  { %v1723_v41 = vadd.f32 %v1722_v40, %v1710_v39 }
 0x23a   :  { %v1736_v42 = vadd.f32 %v1735_v7, %v1723_v41 }
 0x23c   :  { %v1746_v45 = vmax.f32 %v1736_v42, 0.0 }
 0x23e   :  { %v1754_v46 = vpack.c.bf16 %v1746_v45, %v1746_v45 }
 0x23f   :  { %v1724_v47 = vpop.f32.mrf.mxu0 }
 0x240   :  { %2370 = vmatmul.bf16.vlgmr.msra.gmra.mxu1 %v1754_v46 }
 0x241   :  { %v2280_v44 = vpop.f32.mrf.mxu2 }
 0x242   :  { %v2281_v49 = vadd.f32 %v3688_v48, %v2280_v44 }
 0x247   :  { %v2293_v51 = vpop.f32.mrf.mxu3 }
 0x248   :  { %v2294_v52 = vadd.f32 %v2293_v51, %v2281_v49 }
 0x249   :  { %v2282_v55 = vpop.f32.mrf.mxu2 }
 0x24f   :  { %v2295_v56 = vpop.f32.mrf.mxu3 }
 0x257   :  { %v2306_v57 = vpop.f32.mrf.mxu0 }
 0x258   :  { %v2307_v37 = vadd.f32 %v2306_v57, %v2294_v52 }
 0x25d   :  { %v2319_v59 = vpop.f32.mrf.mxu1 }
 0x25e   :  { %v2320_v60 = vadd.f32 %v2319_v59, %v2307_v37 }
 0x25f   :  { %v2308_v22 = vpop.f32.mrf.mxu0 }
 0x265   :  { %v2321_v61 = vpop.f32.mrf.mxu1 }
 0x281   :  { %v2332_v58 = vpop.f32.mrf.mxu2 }
 0x282   :  { %v2333_v2 = vadd.f32 %v2332_v58, %v2320_v60 }
 0x288   :  { %v2345_v24 = vpop.f32.mrf.mxu3 }
 0x289   :  { %v2334_v53 = vpop.f32.mrf.mxu2  ;;  %v2346_v14 = vadd.f32 %v2345_v24, %v2333_v2 }
 0x290   :  { %v2347_v62 = vpop.f32.mrf.mxu3 }
 0x29f   :  { %v2358_v1 = vpop.f32.mrf.mxu0 }
 0x2a0   :  { %v2359_v63 = vadd.f32 %v2358_v1, %v2346_v14 }
 0x2a7   :  { %v2360_v10 = vpop.f32.mrf.mxu0 }
 0x2bd   :  { %v2371_v3 = vpop.f32.mrf.mxu1 }
 0x2be   :  { %v2372_v4 = vadd.f32 %v2371_v3, %v2359_v63 }
 0x2c0   :  { %2375 = vst [vmem:[#allocation8] sm:$0x3] %v2372_v4 }
 0x2c1   :  { %2386 = dma.vmem_to_hbm [thread:$0]  %s2382_s21, 32, %s2384_s24, [#allocation4]  }
 0x2c5   :  { %v2373_v6 = vpop.f32.mrf.mxu1 }
 0x2c6   :  { %3791 = dma.done.wait [#allocation4], 32  }
 0x2c7   :  { %3792 = vsyncadd [#allocation4], 4294967264 }
 0x2c8   :  { %2391 = vsyncpa [#allocation3], 1 }
 0x2c9   :  { %2392 = vsyncpa [#allocation6], 1 }
 0x2ca   :  { %2393 = vsyncpa [#allocation4], 1 }

</bundles_post_ra>
